<compile_context>
chip_gen: v7x
topology: tpu7x:2x2x1
jax: 0.10.0
libtpu: 0.0.40
codegen_flags: <defaults>
</compile_context>

<pallas_src>
import functools
import numpy as np

import jax
import jax.numpy as jnp
from jax.experimental import pallas as pl
from jax.experimental.pallas import tpu as pltpu

# ---------------- hyper-parameters (the `args` of the module) ----------------
N_USERS = 8          # n_users
N_ITEMS = 12         # n_items
EMB = 16             # embedding_size
N_BEH = 3            # len(behaviors)
LAYERS = 2           # LightGCN layers
REG_WEIGHT = 0.01
LOG_REG = 0.5
BATCH = 4
NEG = 2
BPR_GAMMA = 1e-10


# ------------------------------ fused Pallas kernel --------------------------
def _bipn_fused_kernel(ag_ref, ab_ref, e_ref,
                       wr_ref, wz_ref, wu_ref, bhv_ref,
                       pos_ref, pair_ref, padded_ref, deg_ref,
                       o_ref, *,
                       layers, n_u_p1, d, nb, L,
                       log_reg, reg_weight, bpr_gamma):
    f32 = jnp.float32
    e0 = e_ref[...]                      # raw [user | item] embedding table (N, D)
    n_total = e0.shape[0]

    # ---------------- twin LightGCN, fused, tables stay in vregs -------------
    # global propagation on the raw embeddings
    cur = e0
    acc = e0
    ag = ag_ref[...]
    for _ in range(layers):
        cur = jnp.dot(ag, cur, preferred_element_type=f32)
        acc = acc + cur
    all_out = acc * (1.0 / (layers + 1))             # global-propagated table

    # behavior propagation takes the *global* output as input (as in PyTorch)
    cur = all_out
    acc = all_out
    ab = ab_ref[...]
    for _ in range(layers):
        cur = jnp.dot(ab, cur, preferred_element_type=f32)
        acc = acc + cur
    buy_out = acc * (1.0 / (layers + 1))             # behavior-propagated table

    # ---------------- in-kernel row gather: one-hot matmul -------------------
    def gather(table, idx_col):
        n_cols = table.shape[0]
        lane = jax.lax.broadcasted_iota(jnp.int32, (idx_col.shape[0], n_cols), 1)
        oh = (lane == idx_col).astype(f32)
        return jnp.dot(oh, table, preferred_element_type=f32)

    # weight chunks: static ref slices (zero-cost views); split R / Z weights
    # so no cross-lane slice of a fused RZ result is ever needed.
    wr_u, wr_i, wr_b = wr_ref[0:d, :], wr_ref[d:2 * d, :], wr_ref[2 * d:2 * d + nb, :]
    wz_u, wz_i, wz_b = wz_ref[0:d, :], wz_ref[d:2 * d, :], wz_ref[2 * d:2 * d + nb, :]
    wu_u, wu_i, wu_b = wu_ref[0:d, :], wu_ref[d:2 * d, :], wu_ref[2 * d:2 * d + nb, :]

    def agg_info(u, it, bh):
        r = jax.nn.sigmoid(jnp.dot(u, wr_u, preferred_element_type=f32)
                           + jnp.dot(it, wr_i, preferred_element_type=f32)
                           + jnp.dot(bh, wr_b, preferred_element_type=f32))
        z = jax.nn.sigmoid(jnp.dot(u, wz_u, preferred_element_type=f32)
                           + jnp.dot(it, wz_i, preferred_element_type=f32)
                           + jnp.dot(bh, wz_b, preferred_element_type=f32))
        ru = r * u
        uh = jnp.tanh(jnp.dot(ru, wu_u, preferred_element_type=f32)
                      + jnp.dot(it, wu_i, preferred_element_type=f32)
                      + jnp.dot(bh, wu_b, preferred_element_type=f32))
        return z * uh

    # ---------------- positive branch: BCE log loss ---------------------------
    pos = pos_ref[...]                               # (B, 4) int32
    B = pos.shape[0]
    p_u = pos[:, 0:1]
    p_i = pos[:, 1:2] + n_u_p1                       # item rows live after users
    p_b = pos[:, 2:3]
    gt = pos[:, 3:4].astype(f32)

    p_u_emb = gather(all_out, p_u)                   # (B, D)
    p_i_emb = gather(all_out, p_i)                   # (B, D)
    bhv_emb = gather(bhv_ref[...], p_b)              # (B, Nb)

    u_final = agg_info(p_u_emb, p_i_emb, bhv_emb)
    score = jnp.sum(u_final * p_i_emb, axis=-1, keepdims=True)      # (B, 1)
    prob = jax.nn.sigmoid(score)
    log_p = jnp.maximum(jnp.log(prob), -100.0)       # BCELoss log clamp
    log_1mp = jnp.maximum(jnp.log(1.0 - prob), -100.0)
    log_loss = -jnp.sum(gt * log_p + (1.0 - gt) * log_1mp,
                        keepdims=True) * (1.0 / B)   # (1, 1)

    # ---------------- BPR branch (masked-mean over valid pair rows) ----------
    pair = pair_ref[...]                             # (B, 3) int32
    u_s = pair[:, 0:1]
    i_p = pair[:, 1:2] + n_u_p1
    i_n = pair[:, 2:3] + n_u_p1
    valid = ((pair[:, 0:1] != 0) | (pair[:, 1:2] != 0)
             | (pair[:, 2:3] != 0)).astype(f32)      # (B, 1)

    u_emb = gather(all_out, u_s)
    i_p_emb = gather(all_out, i_p)
    i_n_emb = gather(all_out, i_n)
    u_buy = gather(buy_out, u_s)
    i_p_buy = gather(buy_out, i_p)
    i_n_buy = gather(buy_out, i_n)

    # user_agg_item: all (B*L, D) work kept in VMEM / vregs
    padded = padded_ref[...]                         # (B*L, 1) int32, row-major
    M = B * L
    agg_item_emb = gather(all_out, padded + n_u_p1)  # (M, D)

    # replicate each user row L times with a 0/1 matmul (no in-kernel repeat)
    m_io = jax.lax.broadcasted_iota(jnp.int32, (M, B), 0)
    b_io = jax.lax.broadcasted_iota(jnp.int32, (M, B), 1) * L
    rep = ((m_io >= b_io) & (m_io < b_io + L)).astype(f32)          # (M, B)
    u_in = jnp.dot(rep, u_emb, preferred_element_type=f32)          # (M, D)
    bhv_last = jnp.broadcast_to(bhv_ref[nb - 1:nb, :], (M, nb))     # (M, Nb)

    uf = agg_info(u_in, agg_item_emb, bhv_last)                     # (M, D)
    uf = jnp.where(padded == 0, 0.0, uf)             # u_final[mask] = 0

    # per-user sum over the L list positions, again as a 0/1 matmul
    b_io2 = jax.lax.broadcasted_iota(jnp.int32, (B, M), 0) * L
    m_io2 = jax.lax.broadcasted_iota(jnp.int32, (B, M), 1)
    sum_mat = ((m_io2 >= b_io2) & (m_io2 < b_io2 + L)).astype(f32)  # (B, M)
    u_point = jnp.dot(sum_mat, uf, preferred_element_type=f32)      # (B, D)

    deg = deg_ref[...]                                              # (B, 1)
    # clamp lamb to 0 on invalid (masked) rows — same loss, no 1e8 intermediates
    lamb = jnp.where(valid > 0, 1.0 / (deg + 1e-8), 0.0)

    u_gen = u_emb + u_buy
    i_p_fin = i_p_emb + i_p_buy
    i_n_fin = i_n_emb + i_n_buy

    sp_p = jnp.sum(u_point * i_p_emb, axis=-1, keepdims=True)
    sp_n = jnp.sum(u_point * i_n_emb, axis=-1, keepdims=True)
    sg_p = jnp.sum(u_gen * i_p_fin, axis=-1, keepdims=True)
    sg_n = jnp.sum(u_gen * i_n_fin, axis=-1, keepdims=True)

    bpr_p = (1.0 - lamb) * sp_p + lamb * sg_p
    bpr_n = (1.0 - lamb) * sp_n + lamb * sg_n
    per_pair = -jnp.log(bpr_gamma + jax.nn.sigmoid(bpr_p - bpr_n))  # (B, 1)
    n_valid = jnp.sum(valid, keepdims=True)                         # (1, 1)
    bpr_sum = jnp.sum(per_pair * valid, keepdims=True)              # (1, 1)
    bpr_loss = jnp.where(n_valid > 0,
                         bpr_sum / jnp.maximum(n_valid, 1.0), 0.0)  # (1, 1)

    # ---------------- EmbLoss on raw tables (already resident) ---------------
    row = jax.lax.broadcasted_iota(jnp.int32, (n_total, 1), 0)
    is_user = (row < n_u_p1).astype(f32)
    sq = e0 * e0
    ssq_u = jnp.sum(sq * is_user, keepdims=True)
    ssq_i = jnp.sum(sq * (1.0 - is_user), keepdims=True)
    emb_loss = (jnp.sqrt(ssq_u) + jnp.sqrt(ssq_i)) * (1.0 / (n_total - n_u_p1))

    loss = log_reg * log_loss + (1.0 - log_reg) * bpr_loss + reg_weight * emb_loss
    # lane-dense store: (1, 128) slab; wrapper reads element [0, 0]
    o_ref[...] = jnp.broadcast_to(loss, o_ref.shape)


# ------------------------------- forward pass --------------------------------
def bipn_forward(params, consts, x):
    n_u_p1 = params["user_emb"].shape[0]
    all_emb = jnp.concatenate([params["user_emb"], params["item_emb"]], axis=0)
    n_total = all_emb.shape[0]
    b = x.shape[0]

    pos = x[:, 0, :].astype(jnp.int32)                      # (B, 4)
    pair = x[:, -1, :3].astype(jnp.int32)                   # (B, 3)
    user_s = pair[:, 0]
    # TODO(synk): padded-item / degree table lookups stay in XLA (tiny int
    # gathers that produce kernel inputs; everything downstream is fused).
    padded = consts["padded_items"][user_s]                 # (B, L) int32
    deg = consts["degree"][user_s][:, None]                 # (B, 1) f32
    L = padded.shape[1]
    padded_flat = padded.reshape(-1, 1)                     # (B*L, 1)

    kernel = functools.partial(
        _bipn_fused_kernel,
        layers=LAYERS, n_u_p1=n_u_p1, d=EMB, nb=N_BEH, L=L,
        log_reg=LOG_REG, reg_weight=REG_WEIGHT, bpr_gamma=BPR_GAMMA)

    m_rows = b + b * L
    flops = (4 * LAYERS * n_total * n_total * EMB            # two GCN chains
             + 2 * 12 * m_rows * n_total * EMB               # one-hot gathers
             + 2 * 18 * m_rows * EMB * EMB)                  # gate matmuls
    transcendentals = m_rows * 3 * EMB + 6 * b
    bytes_accessed = 4 * (2 * n_total * n_total + n_total * EMB
                          + 3 * (2 * EMB + N_BEH) * EMB + N_BEH * N_BEH
                          + 4 * b + 3 * b + b * L + b + 128)

    vmem = pl.BlockSpec(memory_space=pltpu.MemorySpace.VMEM)
    out = pl.pallas_call(
        kernel,
        out_shape=jax.ShapeDtypeStruct((1, 128), jnp.float32),
        in_specs=[vmem] * 11,
        out_specs=vmem,
        cost_estimate=pl.CostEstimate(flops=int(flops),
                                      transcendentals=int(transcendentals),
                                      bytes_accessed=int(bytes_accessed)),
    )(consts["A_global"], consts["A_behavior"], all_emb,
      params["w_r"], params["w_z"], params["w_u"], params["bhv_embs"],
      pos, pair, padded_flat, deg)
    return out[0, 0]


# --------------------------- deterministic setup ------------------------------
def build_params(key):
    k1, k2, k3, k4 = jax.random.split(key, 4)
    bu = float(np.sqrt(6.0 / (N_USERS + 1 + EMB)))            # xavier_uniform
    bi = float(np.sqrt(6.0 / (N_ITEMS + 1 + EMB)))
    user_emb = jax.random.uniform(k1, (N_USERS + 1, EMB), jnp.float32, -bu, bu)
    item_emb = jax.random.uniform(k2, (N_ITEMS + 1, EMB), jnp.float32, -bi, bi)
    bhv = jnp.eye(N_BEH, dtype=jnp.float32)                   # torch.eye param
    std_rz = float(np.sqrt(2.0 / (2 * EMB + 2 * EMB + N_BEH)))  # xavier_normal
    std_u = float(np.sqrt(2.0 / (EMB + 2 * EMB + N_BEH)))
    w_rz = std_rz * jax.random.normal(k3, (2 * EMB, 2 * EMB + N_BEH), jnp.float32)
    w_u = std_u * jax.random.normal(k4, (EMB, 2 * EMB + N_BEH), jnp.float32)
    return {
        "user_emb": user_emb, "item_emb": item_emb, "bhv_embs": bhv,
        # split the RZ Linear by output chunk (R | Z), keep U whole, and
        # pre-transpose so the kernel computes x_chunk @ W directly.
        # Row ordering of each (2D+Nb, D) weight is [u-chunk | i-chunk | bhv].
        "w_r": w_rz[:EMB, :].T,        # (2D+Nb, D)
        "w_z": w_rz[EMB:, :].T,        # (2D+Nb, D)  == torch.chunk(RZ,2)[1]
        "w_u": w_u.T,                  # (2D+Nb, D)
    }


def _normalize_adj(R):
    n_u, n_i = R.shape
    n = n_u + n_i
    A = np.zeros((n, n), np.float32)
    A[:n_u, n_u:] = R
    A[n_u:, :n_u] = R.T
    deg = A.sum(1)
    d_inv = np.where(deg > 0, deg ** -0.5, 0.0).astype(np.float32)
    return (d_inv[:, None] * A) * d_inv[None, :]


def build_consts(key):
    ka, kb = jax.random.split(key)
    R_all = np.array(jax.random.bernoulli(ka, 0.5, (N_USERS + 1, N_ITEMS + 1)),
                     np.float32)
    R_all[0, :] = 0.0
    R_all[:, 0] = 0.0
    R_buy = R_all * np.array(jax.random.bernoulli(kb, 0.7, R_all.shape), np.float32)
    for u in range(1, N_USERS + 1):           # every real user has >=1 buy
        it = 1 + (u - 1) % N_ITEMS
        R_all[u, it] = 1.0
        R_buy[u, it] = 1.0
    inter_sets = [[i for i in range(1, N_ITEMS + 1) if R_buy[u, i] > 0]
                  for u in range(N_USERS + 1)]
    max_len = max(len(s) for s in inter_sets)
    padded = np.zeros((N_USERS + 1, max_len), np.int32)
    degree = np.zeros((N_USERS + 1,), np.float32)
    for u, s in enumerate(inter_sets):
        padded[u, :len(s)] = s
        degree[u] = len(s)
    return {
        "A_global": jnp.asarray(_normalize_adj(R_all)),
        "A_behavior": jnp.asarray(_normalize_adj(R_buy)),
        "padded_items": jnp.asarray(padded),
        "degree": jnp.asarray(degree),
    }


def build_x(key):
    ks = jax.random.split(key, 6)
    x = np.zeros((BATCH, 2 + NEG, 4), np.int32)
    p_u = np.array(jax.random.randint(ks[0], (BATCH,), 1, N_USERS + 1))
    p_i = np.array(jax.random.randint(ks[1], (BATCH,), 1, N_ITEMS + 1))
    p_b = np.array(jax.random.randint(ks[2], (BATCH,), 0, N_BEH))
    x[:, 0, 0] = p_u; x[:, 0, 1] = p_i; x[:, 0, 2] = p_b; x[:, 0, 3] = 1
    n_u = np.array(jax.random.randint(ks[3], (BATCH, NEG), 1, N_USERS + 1))
    n_i = np.array(jax.random.randint(ks[4], (BATCH, NEG), 1, N_ITEMS + 1))
    x[:, 1:-1, 0] = n_u; x[:, 1:-1, 1] = n_i
    x[:, 1:-1, 2] = N_BEH - 1; x[:, 1:-1, 3] = 0
    pair_neg = np.array(jax.random.randint(ks[5], (BATCH,), 1, N_ITEMS + 1))
    x[:, -1, 0] = p_u; x[:, -1, 1] = p_i; x[:, -1, 2] = pair_neg
    x[-1, -1, :] = 0                          # one masked-out pair row
    return jnp.asarray(x)


if __name__ == "__main__":
    key = jax.random.PRNGKey(0)
    kp, kc, kx = jax.random.split(key, 3)
    params = build_params(kp)
    consts = build_consts(kc)
    x = build_x(kx)

    loss = jax.jit(bipn_forward)(params, consts, x)
    loss = jax.block_until_ready(loss)
    assert bool(jnp.isfinite(loss)), "loss is not finite"
    print("KERNEL_OK")
</pallas_src>

<mosaic_0001>
module attributes {stable_mosaic.version = 11 : i64} {
  func.func @_bipn_fused_kernel(%arg0: memref<22x22xf32, #tpu.memory_space<vmem>>, %arg1: memref<22x22xf32, #tpu.memory_space<vmem>>, %arg2: memref<22x16xf32, #tpu.memory_space<vmem>>, %arg3: memref<35x16xf32, #tpu.memory_space<vmem>>, %arg4: memref<35x16xf32, #tpu.memory_space<vmem>>, %arg5: memref<35x16xf32, #tpu.memory_space<vmem>>, %arg6: memref<3x3xf32, #tpu.memory_space<vmem>>, %arg7: memref<4x4xi32, #tpu.memory_space<vmem>>, %arg8: memref<4x3xi32, #tpu.memory_space<vmem>>, %arg9: memref<20x1xi32, #tpu.memory_space<vmem>>, %arg10: memref<4x1xf32, #tpu.memory_space<vmem>>, %arg11: memref<1x128xf32, #tpu.memory_space<vmem>>) attributes {dimension_semantics = [], scalar_prefetch = 0 : i64, scratch_operands = 0 : i64, tpu.core_type = #tpu.core_type<tc>} {
    %c0 = arith.constant 0 : index
    %c0_0 = arith.constant 0 : index
    %0 = vector.load %arg2[%c0, %c0_0] : memref<22x16xf32, #tpu.memory_space<vmem>>, vector<22x16xf32>
    %c0_1 = arith.constant 0 : index
    %c0_2 = arith.constant 0 : index
    %1 = vector.load %arg0[%c0_1, %c0_2] : memref<22x22xf32, #tpu.memory_space<vmem>>, vector<22x22xf32>
    %cst = arith.constant dense<0.000000e+00> : vector<22x16xf32>
    %2 = tpu.matmul %1, %0, %cst {dimension_numbers = #tpu.dot_dimension_numbers<[1], [0], [0], [1], [0, 0, 1, 1], [], []>} : vector<22x22xf32>, vector<22x16xf32>, vector<22x16xf32> -> vector<22x16xf32>
    %3 = arith.addf %0, %2 : vector<22x16xf32>
    %cst_3 = arith.constant dense<0.000000e+00> : vector<22x16xf32>
    %4 = tpu.matmul %1, %2, %cst_3 {dimension_numbers = #tpu.dot_dimension_numbers<[1], [0], [0], [1], [0, 0, 1, 1], [], []>} : vector<22x22xf32>, vector<22x16xf32>, vector<22x16xf32> -> vector<22x16xf32>
    %5 = arith.addf %3, %4 : vector<22x16xf32>
    %cst_4 = arith.constant 0.333333343 : f32
    %6 = vector.broadcast %cst_4 : f32 to vector<22x16xf32>
    %7 = arith.mulf %5, %6 : vector<22x16xf32>
    %c0_5 = arith.constant 0 : index
    %c0_6 = arith.constant 0 : index
    %8 = vector.load %arg1[%c0_5, %c0_6] : memref<22x22xf32, #tpu.memory_space<vmem>>, vector<22x22xf32>
    %cst_7 = arith.constant dense<0.000000e+00> : vector<22x16xf32>
    %9 = tpu.matmul %8, %7, %cst_7 {dimension_numbers = #tpu.dot_dimension_numbers<[1], [0], [0], [1], [0, 0, 1, 1], [], []>} : vector<22x22xf32>, vector<22x16xf32>, vector<22x16xf32> -> vector<22x16xf32>
    %10 = arith.addf %7, %9 : vector<22x16xf32>
    %cst_8 = arith.constant dense<0.000000e+00> : vector<22x16xf32>
    %11 = tpu.matmul %8, %9, %cst_8 {dimension_numbers = #tpu.dot_dimension_numbers<[1], [0], [0], [1], [0, 0, 1, 1], [], []>} : vector<22x22xf32>, vector<22x16xf32>, vector<22x16xf32> -> vector<22x16xf32>
    %12 = arith.addf %10, %11 : vector<22x16xf32>
    %cst_9 = arith.constant 0.333333343 : f32
    %13 = vector.broadcast %cst_9 : f32 to vector<22x16xf32>
    %14 = arith.mulf %12, %13 : vector<22x16xf32>
    %c0_10 = arith.constant 0 : index
    %c0_11 = arith.constant 0 : index
    %15 = vector.load %arg3[%c0_10, %c0_11] : memref<35x16xf32, #tpu.memory_space<vmem>>, vector<16x16xf32>
    %c16 = arith.constant 16 : index
    %c0_12 = arith.constant 0 : index
    %16 = vector.load %arg3[%c16, %c0_12] : memref<35x16xf32, #tpu.memory_space<vmem>>, vector<16x16xf32>
    %c32 = arith.constant 32 : index
    %c0_13 = arith.constant 0 : index
    %17 = vector.load %arg3[%c32, %c0_13] : memref<35x16xf32, #tpu.memory_space<vmem>>, vector<3x16xf32>
    %c0_14 = arith.constant 0 : index
    %c0_15 = arith.constant 0 : index
    %18 = vector.load %arg4[%c0_14, %c0_15] : memref<35x16xf32, #tpu.memory_space<vmem>>, vector<16x16xf32>
    %c16_16 = arith.constant 16 : index
    %c0_17 = arith.constant 0 : index
    %19 = vector.load %arg4[%c16_16, %c0_17] : memref<35x16xf32, #tpu.memory_space<vmem>>, vector<16x16xf32>
    %c32_18 = arith.constant 32 : index
    %c0_19 = arith.constant 0 : index
    %20 = vector.load %arg4[%c32_18, %c0_19] : memref<35x16xf32, #tpu.memory_space<vmem>>, vector<3x16xf32>
    %c0_20 = arith.constant 0 : index
    %c0_21 = arith.constant 0 : index
    %21 = vector.load %arg5[%c0_20, %c0_21] : memref<35x16xf32, #tpu.memory_space<vmem>>, vector<16x16xf32>
    %c16_22 = arith.constant 16 : index
    %c0_23 = arith.constant 0 : index
    %22 = vector.load %arg5[%c16_22, %c0_23] : memref<35x16xf32, #tpu.memory_space<vmem>>, vector<16x16xf32>
    %c32_24 = arith.constant 32 : index
    %c0_25 = arith.constant 0 : index
    %23 = vector.load %arg5[%c32_24, %c0_25] : memref<35x16xf32, #tpu.memory_space<vmem>>, vector<3x16xf32>
    %c0_26 = arith.constant 0 : index
    %c0_27 = arith.constant 0 : index
    %24 = vector.load %arg7[%c0_26, %c0_27] : memref<4x4xi32, #tpu.memory_space<vmem>>, vector<4x4xi32>
    %25 = vector.extract_strided_slice %24 {offsets = [0, 0], sizes = [4, 1], strides = [1, 1]} : vector<4x4xi32> to vector<4x1xi32>
    %26 = vector.extract_strided_slice %24 {offsets = [0, 1], sizes = [4, 1], strides = [1, 1]} : vector<4x4xi32> to vector<4x1xi32>
    %c9_i32 = arith.constant 9 : i32
    %27 = vector.broadcast %c9_i32 : i32 to vector<4x1xi32>
    %28 = arith.addi %26, %27 : vector<4x1xi32>
    %29 = vector.extract_strided_slice %24 {offsets = [0, 2], sizes = [4, 1], strides = [1, 1]} : vector<4x4xi32> to vector<4x1xi32>
    %30 = vector.extract_strided_slice %24 {offsets = [0, 3], sizes = [4, 1], strides = [1, 1]} : vector<4x4xi32> to vector<4x1xi32>
    %31 = arith.sitofp %30 : vector<4x1xi32> to vector<4x1xf32>
    %32 = tpu.iota {dimensions = array<i32: 1>} : vector<4x22xi32>
    %33 = vector.broadcast %25 : vector<4x1xi32> to vector<4x22xi32>
    %34 = arith.cmpi eq, %32, %33 : vector<4x22xi32>
    %35 = arith.extui %34 : vector<4x22xi1> to vector<4x22xi32>
    %36 = arith.sitofp %35 : vector<4x22xi32> to vector<4x22xf32>
    %cst_28 = arith.constant dense<0.000000e+00> : vector<4x16xf32>
    %37 = tpu.matmul %36, %7, %cst_28 {dimension_numbers = #tpu.dot_dimension_numbers<[1], [0], [0], [1], [0, 0, 1, 1], [], []>} : vector<4x22xf32>, vector<22x16xf32>, vector<4x16xf32> -> vector<4x16xf32>
    %38 = tpu.iota {dimensions = array<i32: 1>} : vector<4x22xi32>
    %39 = vector.broadcast %28 : vector<4x1xi32> to vector<4x22xi32>
    %40 = arith.cmpi eq, %38, %39 : vector<4x22xi32>
    %41 = arith.extui %40 : vector<4x22xi1> to vector<4x22xi32>
    %42 = arith.sitofp %41 : vector<4x22xi32> to vector<4x22xf32>
    %cst_29 = arith.constant dense<0.000000e+00> : vector<4x16xf32>
    %43 = tpu.matmul %42, %7, %cst_29 {dimension_numbers = #tpu.dot_dimension_numbers<[1], [0], [0], [1], [0, 0, 1, 1], [], []>} : vector<4x22xf32>, vector<22x16xf32>, vector<4x16xf32> -> vector<4x16xf32>
    %c0_30 = arith.constant 0 : index
    %c0_31 = arith.constant 0 : index
    %44 = vector.load %arg6[%c0_30, %c0_31] : memref<3x3xf32, #tpu.memory_space<vmem>>, vector<3x3xf32>
    %45 = tpu.iota {dimensions = array<i32: 1>} : vector<4x3xi32>
    %46 = vector.broadcast %29 : vector<4x1xi32> to vector<4x3xi32>
    %47 = arith.cmpi eq, %45, %46 : vector<4x3xi32>
    %48 = arith.extui %47 : vector<4x3xi1> to vector<4x3xi32>
    %49 = arith.sitofp %48 : vector<4x3xi32> to vector<4x3xf32>
    %cst_32 = arith.constant dense<0.000000e+00> : vector<4x3xf32>
    %50 = tpu.matmul %49, %44, %cst_32 {dimension_numbers = #tpu.dot_dimension_numbers<[1], [0], [0], [1], [0, 0, 1, 1], [], []>} : vector<4x3xf32>, vector<3x3xf32>, vector<4x3xf32> -> vector<4x3xf32>
    %cst_33 = arith.constant dense<0.000000e+00> : vector<4x16xf32>
    %51 = tpu.matmul %37, %15, %cst_33 {dimension_numbers = #tpu.dot_dimension_numbers<[1], [0], [0], [1], [0, 0, 1, 1], [], []>} : vector<4x16xf32>, vector<16x16xf32>, vector<4x16xf32> -> vector<4x16xf32>
    %cst_34 = arith.constant dense<0.000000e+00> : vector<4x16xf32>
    %52 = tpu.matmul %43, %16, %cst_34 {dimension_numbers = #tpu.dot_dimension_numbers<[1], [0], [0], [1], [0, 0, 1, 1], [], []>} : vector<4x16xf32>, vector<16x16xf32>, vector<4x16xf32> -> vector<4x16xf32>
    %53 = arith.addf %51, %52 : vector<4x16xf32>
    %cst_35 = arith.constant dense<0.000000e+00> : vector<4x16xf32>
    %54 = tpu.matmul %50, %17, %cst_35 {dimension_numbers = #tpu.dot_dimension_numbers<[1], [0], [0], [1], [0, 0, 1, 1], [], []>} : vector<4x3xf32>, vector<3x16xf32>, vector<4x16xf32> -> vector<4x16xf32>
    %55 = arith.addf %53, %54 : vector<4x16xf32>
    %56 = arith.negf %55 : vector<4x16xf32>
    %57 = math.exp %56 : vector<4x16xf32>
    %cst_36 = arith.constant 1.000000e+00 : f32
    %58 = vector.broadcast %cst_36 : f32 to vector<4x16xf32>
    %59 = arith.addf %58, %57 : vector<4x16xf32>
    %60 = arith.divf %58, %59 : vector<4x16xf32>
    %cst_37 = arith.constant dense<0.000000e+00> : vector<4x16xf32>
    %61 = tpu.matmul %37, %18, %cst_37 {dimension_numbers = #tpu.dot_dimension_numbers<[1], [0], [0], [1], [0, 0, 1, 1], [], []>} : vector<4x16xf32>, vector<16x16xf32>, vector<4x16xf32> -> vector<4x16xf32>
    %cst_38 = arith.constant dense<0.000000e+00> : vector<4x16xf32>
    %62 = tpu.matmul %43, %19, %cst_38 {dimension_numbers = #tpu.dot_dimension_numbers<[1], [0], [0], [1], [0, 0, 1, 1], [], []>} : vector<4x16xf32>, vector<16x16xf32>, vector<4x16xf32> -> vector<4x16xf32>
    %63 = arith.addf %61, %62 : vector<4x16xf32>
    %cst_39 = arith.constant dense<0.000000e+00> : vector<4x16xf32>
    %64 = tpu.matmul %50, %20, %cst_39 {dimension_numbers = #tpu.dot_dimension_numbers<[1], [0], [0], [1], [0, 0, 1, 1], [], []>} : vector<4x3xf32>, vector<3x16xf32>, vector<4x16xf32> -> vector<4x16xf32>
    %65 = arith.addf %63, %64 : vector<4x16xf32>
    %66 = arith.negf %65 : vector<4x16xf32>
    %67 = math.exp %66 : vector<4x16xf32>
    %cst_40 = arith.constant 1.000000e+00 : f32
    %68 = vector.broadcast %cst_40 : f32 to vector<4x16xf32>
    %69 = arith.addf %68, %67 : vector<4x16xf32>
    %70 = arith.divf %68, %69 : vector<4x16xf32>
    %71 = arith.mulf %60, %37 : vector<4x16xf32>
    %cst_41 = arith.constant dense<0.000000e+00> : vector<4x16xf32>
    %72 = tpu.matmul %71, %21, %cst_41 {dimension_numbers = #tpu.dot_dimension_numbers<[1], [0], [0], [1], [0, 0, 1, 1], [], []>} : vector<4x16xf32>, vector<16x16xf32>, vector<4x16xf32> -> vector<4x16xf32>
    %cst_42 = arith.constant dense<0.000000e+00> : vector<4x16xf32>
    %73 = tpu.matmul %43, %22, %cst_42 {dimension_numbers = #tpu.dot_dimension_numbers<[1], [0], [0], [1], [0, 0, 1, 1], [], []>} : vector<4x16xf32>, vector<16x16xf32>, vector<4x16xf32> -> vector<4x16xf32>
    %74 = arith.addf %72, %73 : vector<4x16xf32>
    %cst_43 = arith.constant dense<0.000000e+00> : vector<4x16xf32>
    %75 = tpu.matmul %50, %23, %cst_43 {dimension_numbers = #tpu.dot_dimension_numbers<[1], [0], [0], [1], [0, 0, 1, 1], [], []>} : vector<4x3xf32>, vector<3x16xf32>, vector<4x16xf32> -> vector<4x16xf32>
    %76 = arith.addf %74, %75 : vector<4x16xf32>
    %77 = math.tanh %76 : vector<4x16xf32>
    %78 = arith.mulf %70, %77 : vector<4x16xf32>
    %79 = arith.mulf %78, %43 : vector<4x16xf32>
    %cst_44 = arith.constant dense<0.000000e+00> : vector<4xf32>
    %80 = vector.multi_reduction <add>, %79, %cst_44 [1] : vector<4x16xf32> to vector<4xf32>
    %81 = vector.shape_cast %80 : vector<4xf32> to vector<4x1xf32>
    %82 = arith.negf %81 : vector<4x1xf32>
    %83 = math.exp %82 : vector<4x1xf32>
    %cst_45 = arith.constant 1.000000e+00 : f32
    %84 = vector.broadcast %cst_45 : f32 to vector<4x1xf32>
    %85 = arith.addf %84, %83 : vector<4x1xf32>
    %86 = arith.divf %84, %85 : vector<4x1xf32>
    %87 = math.log %86 : vector<4x1xf32>
    %cst_46 = arith.constant -1.000000e+02 : f32
    %88 = vector.broadcast %cst_46 : f32 to vector<4x1xf32>
    %89 = arith.maximumf %87, %88 : vector<4x1xf32>
    %cst_47 = arith.constant 1.000000e+00 : f32
    %90 = vector.broadcast %cst_47 : f32 to vector<4x1xf32>
    %91 = arith.subf %90, %86 : vector<4x1xf32>
    %92 = math.log %91 : vector<4x1xf32>
    %cst_48 = arith.constant -1.000000e+02 : f32
    %93 = vector.broadcast %cst_48 : f32 to vector<4x1xf32>
    %94 = arith.maximumf %92, %93 : vector<4x1xf32>
    %95 = arith.mulf %31, %89 : vector<4x1xf32>
    %cst_49 = arith.constant 1.000000e+00 : f32
    %96 = vector.broadcast %cst_49 : f32 to vector<4x1xf32>
    %97 = arith.subf %96, %31 : vector<4x1xf32>
    %98 = arith.mulf %97, %94 : vector<4x1xf32>
    %99 = arith.addf %95, %98 : vector<4x1xf32>
    %100 = vector.shape_cast %99 : vector<4x1xf32> to vector<1x4x1xf32>
    %cst_50 = arith.constant dense<0.000000e+00> : vector<1xf32>
    %101 = vector.multi_reduction <add>, %100, %cst_50 [1, 2] : vector<1x4x1xf32> to vector<1xf32>
    %102 = vector.shape_cast %101 : vector<1xf32> to vector<1x1x1xf32>
    %103 = vector.extract %102[0, 0, 0] : f32 from vector<1x1x1xf32>
    %104 = vector.broadcast %103 : f32 to vector<1x1xf32>
    %cst_51 = arith.constant 0.000000e+00 : f32
    %105 = vector.broadcast %cst_51 : f32 to vector<1x1xf32>
    %106 = arith.subf %105, %104 : vector<1x1xf32>
    %cst_52 = arith.constant 2.500000e-01 : f32
    %107 = vector.broadcast %cst_52 : f32 to vector<1x1xf32>
    %108 = arith.mulf %106, %107 : vector<1x1xf32>
    %c0_53 = arith.constant 0 : index
    %c0_54 = arith.constant 0 : index
    %109 = vector.load %arg8[%c0_53, %c0_54] : memref<4x3xi32, #tpu.memory_space<vmem>>, vector<4x3xi32>
    %110 = vector.extract_strided_slice %109 {offsets = [0, 0], sizes = [4, 1], strides = [1, 1]} : vector<4x3xi32> to vector<4x1xi32>
    %111 = vector.extract_strided_slice %109 {offsets = [0, 1], sizes = [4, 1], strides = [1, 1]} : vector<4x3xi32> to vector<4x1xi32>
    %c9_i32_55 = arith.constant 9 : i32
    %112 = vector.broadcast %c9_i32_55 : i32 to vector<4x1xi32>
    %113 = arith.addi %111, %112 : vector<4x1xi32>
    %114 = vector.extract_strided_slice %109 {offsets = [0, 2], sizes = [4, 1], strides = [1, 1]} : vector<4x3xi32> to vector<4x1xi32>
    %c9_i32_56 = arith.constant 9 : i32
    %115 = vector.broadcast %c9_i32_56 : i32 to vector<4x1xi32>
    %116 = arith.addi %114, %115 : vector<4x1xi32>
    %117 = vector.extract_strided_slice %109 {offsets = [0, 0], sizes = [4, 1], strides = [1, 1]} : vector<4x3xi32> to vector<4x1xi32>
    %c0_i32 = arith.constant 0 : i32
    %118 = vector.broadcast %c0_i32 : i32 to vector<4x1xi32>
    %119 = arith.cmpi ne, %117, %118 : vector<4x1xi32>
    %120 = vector.extract_strided_slice %109 {offsets = [0, 1], sizes = [4, 1], strides = [1, 1]} : vector<4x3xi32> to vector<4x1xi32>
    %c0_i32_57 = arith.constant 0 : i32
    %121 = vector.broadcast %c0_i32_57 : i32 to vector<4x1xi32>
    %122 = arith.cmpi ne, %120, %121 : vector<4x1xi32>
    %123 = arith.ori %119, %122 : vector<4x1xi1>
    %124 = vector.extract_strided_slice %109 {offsets = [0, 2], sizes = [4, 1], strides = [1, 1]} : vector<4x3xi32> to vector<4x1xi32>
    %c0_i32_58 = arith.constant 0 : i32
    %125 = vector.broadcast %c0_i32_58 : i32 to vector<4x1xi32>
    %126 = arith.cmpi ne, %124, %125 : vector<4x1xi32>
    %127 = arith.ori %123, %126 : vector<4x1xi1>
    %128 = arith.extui %127 : vector<4x1xi1> to vector<4x1xi32>
    %129 = arith.sitofp %128 : vector<4x1xi32> to vector<4x1xf32>
    %130 = tpu.iota {dimensions = array<i32: 1>} : vector<4x22xi32>
    %131 = vector.broadcast %110 : vector<4x1xi32> to vector<4x22xi32>
    %132 = arith.cmpi eq, %130, %131 : vector<4x22xi32>
    %133 = arith.extui %132 : vector<4x22xi1> to vector<4x22xi32>
    %134 = arith.sitofp %133 : vector<4x22xi32> to vector<4x22xf32>
    %cst_59 = arith.constant dense<0.000000e+00> : vector<4x16xf32>
    %135 = tpu.matmul %134, %7, %cst_59 {dimension_numbers = #tpu.dot_dimension_numbers<[1], [0], [0], [1], [0, 0, 1, 1], [], []>} : vector<4x22xf32>, vector<22x16xf32>, vector<4x16xf32> -> vector<4x16xf32>
    %136 = tpu.iota {dimensions = array<i32: 1>} : vector<4x22xi32>
    %137 = vector.broadcast %113 : vector<4x1xi32> to vector<4x22xi32>
    %138 = arith.cmpi eq, %136, %137 : vector<4x22xi32>
    %139 = arith.extui %138 : vector<4x22xi1> to vector<4x22xi32>
    %140 = arith.sitofp %139 : vector<4x22xi32> to vector<4x22xf32>
    %cst_60 = arith.constant dense<0.000000e+00> : vector<4x16xf32>
    %141 = tpu.matmul %140, %7, %cst_60 {dimension_numbers = #tpu.dot_dimension_numbers<[1], [0], [0], [1], [0, 0, 1, 1], [], []>} : vector<4x22xf32>, vector<22x16xf32>, vector<4x16xf32> -> vector<4x16xf32>
    %142 = tpu.iota {dimensions = array<i32: 1>} : vector<4x22xi32>
    %143 = vector.broadcast %116 : vector<4x1xi32> to vector<4x22xi32>
    %144 = arith.cmpi eq, %142, %143 : vector<4x22xi32>
    %145 = arith.extui %144 : vector<4x22xi1> to vector<4x22xi32>
    %146 = arith.sitofp %145 : vector<4x22xi32> to vector<4x22xf32>
    %cst_61 = arith.constant dense<0.000000e+00> : vector<4x16xf32>
    %147 = tpu.matmul %146, %7, %cst_61 {dimension_numbers = #tpu.dot_dimension_numbers<[1], [0], [0], [1], [0, 0, 1, 1], [], []>} : vector<4x22xf32>, vector<22x16xf32>, vector<4x16xf32> -> vector<4x16xf32>
    %148 = tpu.iota {dimensions = array<i32: 1>} : vector<4x22xi32>
    %149 = vector.broadcast %110 : vector<4x1xi32> to vector<4x22xi32>
    %150 = arith.cmpi eq, %148, %149 : vector<4x22xi32>
    %151 = arith.extui %150 : vector<4x22xi1> to vector<4x22xi32>
    %152 = arith.sitofp %151 : vector<4x22xi32> to vector<4x22xf32>
    %cst_62 = arith.constant dense<0.000000e+00> : vector<4x16xf32>
    %153 = tpu.matmul %152, %14, %cst_62 {dimension_numbers = #tpu.dot_dimension_numbers<[1], [0], [0], [1], [0, 0, 1, 1], [], []>} : vector<4x22xf32>, vector<22x16xf32>, vector<4x16xf32> -> vector<4x16xf32>
    %154 = tpu.iota {dimensions = array<i32: 1>} : vector<4x22xi32>
    %155 = vector.broadcast %113 : vector<4x1xi32> to vector<4x22xi32>
    %156 = arith.cmpi eq, %154, %155 : vector<4x22xi32>
    %157 = arith.extui %156 : vector<4x22xi1> to vector<4x22xi32>
    %158 = arith.sitofp %157 : vector<4x22xi32> to vector<4x22xf32>
    %cst_63 = arith.constant dense<0.000000e+00> : vector<4x16xf32>
    %159 = tpu.matmul %158, %14, %cst_63 {dimension_numbers = #tpu.dot_dimension_numbers<[1], [0], [0], [1], [0, 0, 1, 1], [], []>} : vector<4x22xf32>, vector<22x16xf32>, vector<4x16xf32> -> vector<4x16xf32>
    %160 = tpu.iota {dimensions = array<i32: 1>} : vector<4x22xi32>
    %161 = vector.broadcast %116 : vector<4x1xi32> to vector<4x22xi32>
    %162 = arith.cmpi eq, %160, %161 : vector<4x22xi32>
    %163 = arith.extui %162 : vector<4x22xi1> to vector<4x22xi32>
    %164 = arith.sitofp %163 : vector<4x22xi32> to vector<4x22xf32>
    %cst_64 = arith.constant dense<0.000000e+00> : vector<4x16xf32>
    %165 = tpu.matmul %164, %14, %cst_64 {dimension_numbers = #tpu.dot_dimension_numbers<[1], [0], [0], [1], [0, 0, 1, 1], [], []>} : vector<4x22xf32>, vector<22x16xf32>, vector<4x16xf32> -> vector<4x16xf32>
    %c0_65 = arith.constant 0 : index
    %c0_66 = arith.constant 0 : index
    %166 = vector.load %arg9[%c0_65, %c0_66] : memref<20x1xi32, #tpu.memory_space<vmem>>, vector<20x1xi32>
    %c9_i32_67 = arith.constant 9 : i32
    %167 = vector.broadcast %c9_i32_67 : i32 to vector<20x1xi32>
    %168 = arith.addi %166, %167 : vector<20x1xi32>
    %169 = tpu.iota {dimensions = array<i32: 1>} : vector<20x22xi32>
    %170 = vector.broadcast %168 : vector<20x1xi32> to vector<20x22xi32>
    %171 = arith.cmpi eq, %169, %170 : vector<20x22xi32>
    %172 = arith.extui %171 : vector<20x22xi1> to vector<20x22xi32>
    %173 = arith.sitofp %172 : vector<20x22xi32> to vector<20x22xf32>
    %cst_68 = arith.constant dense<0.000000e+00> : vector<20x16xf32>
    %174 = tpu.matmul %173, %7, %cst_68 {dimension_numbers = #tpu.dot_dimension_numbers<[1], [0], [0], [1], [0, 0, 1, 1], [], []>} : vector<20x22xf32>, vector<22x16xf32>, vector<20x16xf32> -> vector<20x16xf32>
    %175 = tpu.iota {dimensions = array<i32: 0>} : vector<20x4xi32>
    %176 = tpu.iota {dimensions = array<i32: 1>} : vector<20x4xi32>
    %c5_i32 = arith.constant 5 : i32
    %177 = vector.broadcast %c5_i32 : i32 to vector<20x4xi32>
    %178 = arith.muli %176, %177 : vector<20x4xi32>
    %179 = arith.cmpi sge, %175, %178 : vector<20x4xi32>
    %c5_i32_69 = arith.constant 5 : i32
    %180 = vector.broadcast %c5_i32_69 : i32 to vector<20x4xi32>
    %181 = arith.addi %178, %180 : vector<20x4xi32>
    %182 = arith.cmpi slt, %175, %181 : vector<20x4xi32>
    %183 = arith.andi %179, %182 : vector<20x4xi1>
    %184 = arith.extui %183 : vector<20x4xi1> to vector<20x4xi32>
    %185 = arith.sitofp %184 : vector<20x4xi32> to vector<20x4xf32>
    %cst_70 = arith.constant dense<0.000000e+00> : vector<20x16xf32>
    %186 = tpu.matmul %185, %135, %cst_70 {dimension_numbers = #tpu.dot_dimension_numbers<[1], [0], [0], [1], [0, 0, 1, 1], [], []>} : vector<20x4xf32>, vector<4x16xf32>, vector<20x16xf32> -> vector<20x16xf32>
    %c2 = arith.constant 2 : index
    %c0_71 = arith.constant 0 : index
    %187 = vector.load %arg6[%c2, %c0_71] : memref<3x3xf32, #tpu.memory_space<vmem>>, vector<1x3xf32>
    %188 = vector.shape_cast %187 : vector<1x3xf32> to vector<1x3xf32>
    %189 = vector.broadcast %188 : vector<1x3xf32> to vector<20x3xf32>
    %cst_72 = arith.constant dense<0.000000e+00> : vector<20x16xf32>
    %190 = tpu.matmul %186, %15, %cst_72 {dimension_numbers = #tpu.dot_dimension_numbers<[1], [0], [0], [1], [0, 0, 1, 1], [], []>} : vector<20x16xf32>, vector<16x16xf32>, vector<20x16xf32> -> vector<20x16xf32>
    %cst_73 = arith.constant dense<0.000000e+00> : vector<20x16xf32>
    %191 = tpu.matmul %174, %16, %cst_73 {dimension_numbers = #tpu.dot_dimension_numbers<[1], [0], [0], [1], [0, 0, 1, 1], [], []>} : vector<20x16xf32>, vector<16x16xf32>, vector<20x16xf32> -> vector<20x16xf32>
    %192 = arith.addf %190, %191 : vector<20x16xf32>
    %cst_74 = arith.constant dense<0.000000e+00> : vector<20x16xf32>
    %193 = tpu.matmul %189, %17, %cst_74 {dimension_numbers = #tpu.dot_dimension_numbers<[1], [0], [0], [1], [0, 0, 1, 1], [], []>} : vector<20x3xf32>, vector<3x16xf32>, vector<20x16xf32> -> vector<20x16xf32>
    %194 = arith.addf %192, %193 : vector<20x16xf32>
    %195 = arith.negf %194 : vector<20x16xf32>
    %196 = math.exp %195 : vector<20x16xf32>
    %cst_75 = arith.constant 1.000000e+00 : f32
    %197 = vector.broadcast %cst_75 : f32 to vector<20x16xf32>
    %198 = arith.addf %197, %196 : vector<20x16xf32>
    %199 = arith.divf %197, %198 : vector<20x16xf32>
    %cst_76 = arith.constant dense<0.000000e+00> : vector<20x16xf32>
    %200 = tpu.matmul %186, %18, %cst_76 {dimension_numbers = #tpu.dot_dimension_numbers<[1], [0], [0], [1], [0, 0, 1, 1], [], []>} : vector<20x16xf32>, vector<16x16xf32>, vector<20x16xf32> -> vector<20x16xf32>
    %cst_77 = arith.constant dense<0.000000e+00> : vector<20x16xf32>
    %201 = tpu.matmul %174, %19, %cst_77 {dimension_numbers = #tpu.dot_dimension_numbers<[1], [0], [0], [1], [0, 0, 1, 1], [], []>} : vector<20x16xf32>, vector<16x16xf32>, vector<20x16xf32> -> vector<20x16xf32>
    %202 = arith.addf %200, %201 : vector<20x16xf32>
    %cst_78 = arith.constant dense<0.000000e+00> : vector<20x16xf32>
    %203 = tpu.matmul %189, %20, %cst_78 {dimension_numbers = #tpu.dot_dimension_numbers<[1], [0], [0], [1], [0, 0, 1, 1], [], []>} : vector<20x3xf32>, vector<3x16xf32>, vector<20x16xf32> -> vector<20x16xf32>
    %204 = arith.addf %202, %203 : vector<20x16xf32>
    %205 = arith.negf %204 : vector<20x16xf32>
    %206 = math.exp %205 : vector<20x16xf32>
    %cst_79 = arith.constant 1.000000e+00 : f32
    %207 = vector.broadcast %cst_79 : f32 to vector<20x16xf32>
    %208 = arith.addf %207, %206 : vector<20x16xf32>
    %209 = arith.divf %207, %208 : vector<20x16xf32>
    %210 = arith.mulf %199, %186 : vector<20x16xf32>
    %cst_80 = arith.constant dense<0.000000e+00> : vector<20x16xf32>
    %211 = tpu.matmul %210, %21, %cst_80 {dimension_numbers = #tpu.dot_dimension_numbers<[1], [0], [0], [1], [0, 0, 1, 1], [], []>} : vector<20x16xf32>, vector<16x16xf32>, vector<20x16xf32> -> vector<20x16xf32>
    %cst_81 = arith.constant dense<0.000000e+00> : vector<20x16xf32>
    %212 = tpu.matmul %174, %22, %cst_81 {dimension_numbers = #tpu.dot_dimension_numbers<[1], [0], [0], [1], [0, 0, 1, 1], [], []>} : vector<20x16xf32>, vector<16x16xf32>, vector<20x16xf32> -> vector<20x16xf32>
    %213 = arith.addf %211, %212 : vector<20x16xf32>
    %cst_82 = arith.constant dense<0.000000e+00> : vector<20x16xf32>
    %214 = tpu.matmul %189, %23, %cst_82 {dimension_numbers = #tpu.dot_dimension_numbers<[1], [0], [0], [1], [0, 0, 1, 1], [], []>} : vector<20x3xf32>, vector<3x16xf32>, vector<20x16xf32> -> vector<20x16xf32>
    %215 = arith.addf %213, %214 : vector<20x16xf32>
    %216 = math.tanh %215 : vector<20x16xf32>
    %217 = arith.mulf %209, %216 : vector<20x16xf32>
    %c0_i32_83 = arith.constant 0 : i32
    %218 = vector.broadcast %c0_i32_83 : i32 to vector<20x1xi32>
    %219 = arith.cmpi eq, %166, %218 : vector<20x1xi32>
    %cst_84 = arith.constant 0.000000e+00 : f32
    %220 = vector.shape_cast %219 : vector<20x1xi1> to vector<20x1xi1>
    %221 = vector.broadcast %220 : vector<20x1xi1> to vector<20x16xi1>
    %222 = vector.broadcast %cst_84 : f32 to vector<20x16xf32>
    %223 = arith.select %221, %222, %217 : vector<20x16xi1>, vector<20x16xf32>
    %224 = tpu.iota {dimensions = array<i32: 0>} : vector<4x20xi32>
    %c5_i32_85 = arith.constant 5 : i32
    %225 = vector.broadcast %c5_i32_85 : i32 to vector<4x20xi32>
    %226 = arith.muli %224, %225 : vector<4x20xi32>
    %227 = tpu.iota {dimensions = array<i32: 1>} : vector<4x20xi32>
    %228 = arith.cmpi sge, %227, %226 : vector<4x20xi32>
    %c5_i32_86 = arith.constant 5 : i32
    %229 = vector.broadcast %c5_i32_86 : i32 to vector<4x20xi32>
    %230 = arith.addi %226, %229 : vector<4x20xi32>
    %231 = arith.cmpi slt, %227, %230 : vector<4x20xi32>
    %232 = arith.andi %228, %231 : vector<4x20xi1>
    %233 = arith.extui %232 : vector<4x20xi1> to vector<4x20xi32>
    %234 = arith.sitofp %233 : vector<4x20xi32> to vector<4x20xf32>
    %cst_87 = arith.constant dense<0.000000e+00> : vector<4x16xf32>
    %235 = tpu.matmul %234, %223, %cst_87 {dimension_numbers = #tpu.dot_dimension_numbers<[1], [0], [0], [1], [0, 0, 1, 1], [], []>} : vector<4x20xf32>, vector<20x16xf32>, vector<4x16xf32> -> vector<4x16xf32>
    %c0_88 = arith.constant 0 : index
    %c0_89 = arith.constant 0 : index
    %236 = vector.load %arg10[%c0_88, %c0_89] : memref<4x1xf32, #tpu.memory_space<vmem>>, vector<4x1xf32>
    %cst_90 = arith.constant 0.000000e+00 : f32
    %237 = vector.broadcast %cst_90 : f32 to vector<4x1xf32>
    %238 = arith.cmpf ogt, %129, %237 : vector<4x1xf32>
    %cst_91 = arith.constant 9.99999993E-9 : f32
    %239 = vector.broadcast %cst_91 : f32 to vector<4x1xf32>
    %240 = arith.addf %236, %239 : vector<4x1xf32>
    %cst_92 = arith.constant 1.000000e+00 : f32
    %241 = vector.broadcast %cst_92 : f32 to vector<4x1xf32>
    %242 = arith.divf %241, %240 : vector<4x1xf32>
    %cst_93 = arith.constant 0.000000e+00 : f32
    %243 = vector.broadcast %cst_93 : f32 to vector<4x1xf32>
    %244 = arith.select %238, %242, %243 : vector<4x1xi1>, vector<4x1xf32>
    %245 = arith.addf %135, %153 : vector<4x16xf32>
    %246 = arith.addf %141, %159 : vector<4x16xf32>
    %247 = arith.addf %147, %165 : vector<4x16xf32>
    %248 = arith.mulf %235, %141 : vector<4x16xf32>
    %cst_94 = arith.constant dense<0.000000e+00> : vector<4xf32>
    %249 = vector.multi_reduction <add>, %248, %cst_94 [1] : vector<4x16xf32> to vector<4xf32>
    %250 = vector.shape_cast %249 : vector<4xf32> to vector<4x1xf32>
    %251 = arith.mulf %235, %147 : vector<4x16xf32>
    %cst_95 = arith.constant dense<0.000000e+00> : vector<4xf32>
    %252 = vector.multi_reduction <add>, %251, %cst_95 [1] : vector<4x16xf32> to vector<4xf32>
    %253 = vector.shape_cast %252 : vector<4xf32> to vector<4x1xf32>
    %254 = arith.mulf %245, %246 : vector<4x16xf32>
    %cst_96 = arith.constant dense<0.000000e+00> : vector<4xf32>
    %255 = vector.multi_reduction <add>, %254, %cst_96 [1] : vector<4x16xf32> to vector<4xf32>
    %256 = vector.shape_cast %255 : vector<4xf32> to vector<4x1xf32>
    %257 = arith.mulf %245, %247 : vector<4x16xf32>
    %cst_97 = arith.constant dense<0.000000e+00> : vector<4xf32>
    %258 = vector.multi_reduction <add>, %257, %cst_97 [1] : vector<4x16xf32> to vector<4xf32>
    %259 = vector.shape_cast %258 : vector<4xf32> to vector<4x1xf32>
    %cst_98 = arith.constant 1.000000e+00 : f32
    %260 = vector.broadcast %cst_98 : f32 to vector<4x1xf32>
    %261 = arith.subf %260, %244 : vector<4x1xf32>
    %262 = arith.mulf %261, %250 : vector<4x1xf32>
    %263 = arith.mulf %244, %256 : vector<4x1xf32>
    %264 = arith.addf %262, %263 : vector<4x1xf32>
    %cst_99 = arith.constant 1.000000e+00 : f32
    %265 = vector.broadcast %cst_99 : f32 to vector<4x1xf32>
    %266 = arith.subf %265, %244 : vector<4x1xf32>
    %267 = arith.mulf %266, %253 : vector<4x1xf32>
    %268 = arith.mulf %244, %259 : vector<4x1xf32>
    %269 = arith.addf %267, %268 : vector<4x1xf32>
    %270 = arith.subf %264, %269 : vector<4x1xf32>
    %271 = arith.negf %270 : vector<4x1xf32>
    %272 = math.exp %271 : vector<4x1xf32>
    %cst_100 = arith.constant 1.000000e+00 : f32
    %273 = vector.broadcast %cst_100 : f32 to vector<4x1xf32>
    %274 = arith.addf %273, %272 : vector<4x1xf32>
    %275 = arith.divf %273, %274 : vector<4x1xf32>
    %cst_101 = arith.constant 1.000000e-10 : f32
    %276 = vector.broadcast %cst_101 : f32 to vector<4x1xf32>
    %277 = arith.addf %276, %275 : vector<4x1xf32>
    %278 = math.log %277 : vector<4x1xf32>
    %cst_102 = arith.constant 0.000000e+00 : f32
    %279 = vector.broadcast %cst_102 : f32 to vector<4x1xf32>
    %280 = arith.subf %279, %278 : vector<4x1xf32>
    %281 = vector.shape_cast %129 : vector<4x1xf32> to vector<1x4x1xf32>
    %cst_103 = arith.constant dense<0.000000e+00> : vector<1xf32>
    %282 = vector.multi_reduction <add>, %281, %cst_103 [1, 2] : vector<1x4x1xf32> to vector<1xf32>
    %283 = vector.shape_cast %282 : vector<1xf32> to vector<1x1x1xf32>
    %284 = vector.extract %283[0, 0, 0] : f32 from vector<1x1x1xf32>
    %285 = vector.broadcast %284 : f32 to vector<1x1xf32>
    %286 = arith.mulf %280, %129 : vector<4x1xf32>
    %287 = vector.shape_cast %286 : vector<4x1xf32> to vector<1x4x1xf32>
    %cst_104 = arith.constant dense<0.000000e+00> : vector<1xf32>
    %288 = vector.multi_reduction <add>, %287, %cst_104 [1, 2] : vector<1x4x1xf32> to vector<1xf32>
    %289 = vector.shape_cast %288 : vector<1xf32> to vector<1x1x1xf32>
    %290 = vector.extract %289[0, 0, 0] : f32 from vector<1x1x1xf32>
    %291 = vector.broadcast %290 : f32 to vector<1x1xf32>
    %cst_105 = arith.constant 0.000000e+00 : f32
    %292 = vector.broadcast %cst_105 : f32 to vector<1x1xf32>
    %293 = arith.cmpf ogt, %285, %292 : vector<1x1xf32>
    %cst_106 = arith.constant 1.000000e+00 : f32
    %294 = vector.broadcast %cst_106 : f32 to vector<1x1xf32>
    %295 = arith.maximumf %285, %294 : vector<1x1xf32>
    %296 = arith.divf %291, %295 : vector<1x1xf32>
    %cst_107 = arith.constant 0.000000e+00 : f32
    %297 = vector.broadcast %cst_107 : f32 to vector<1x1xf32>
    %298 = arith.select %293, %296, %297 : vector<1x1xi1>, vector<1x1xf32>
    %299 = tpu.iota {dimensions = array<i32: 0>} : vector<22x1xi32>
    %c9_i32_108 = arith.constant 9 : i32
    %300 = vector.broadcast %c9_i32_108 : i32 to vector<22x1xi32>
    %301 = arith.cmpi slt, %299, %300 : vector<22x1xi32>
    %302 = arith.extui %301 : vector<22x1xi1> to vector<22x1xi32>
    %303 = arith.sitofp %302 : vector<22x1xi32> to vector<22x1xf32>
    %304 = arith.mulf %0, %0 : vector<22x16xf32>
    %305 = vector.broadcast %303 : vector<22x1xf32> to vector<22x16xf32>
    %306 = arith.mulf %304, %305 : vector<22x16xf32>
    %307 = vector.shape_cast %306 : vector<22x16xf32> to vector<1x22x16xf32>
    %cst_109 = arith.constant dense<0.000000e+00> : vector<1xf32>
    %308 = vector.multi_reduction <add>, %307, %cst_109 [1, 2] : vector<1x22x16xf32> to vector<1xf32>
    %309 = vector.shape_cast %308 : vector<1xf32> to vector<1x1x1xf32>
    %310 = vector.extract %309[0, 0, 0] : f32 from vector<1x1x1xf32>
    %311 = vector.broadcast %310 : f32 to vector<1x1xf32>
    %cst_110 = arith.constant 1.000000e+00 : f32
    %312 = vector.broadcast %cst_110 : f32 to vector<22x1xf32>
    %313 = arith.subf %312, %303 : vector<22x1xf32>
    %314 = vector.broadcast %313 : vector<22x1xf32> to vector<22x16xf32>
    %315 = arith.mulf %304, %314 : vector<22x16xf32>
    %316 = vector.shape_cast %315 : vector<22x16xf32> to vector<1x22x16xf32>
    %cst_111 = arith.constant dense<0.000000e+00> : vector<1xf32>
    %317 = vector.multi_reduction <add>, %316, %cst_111 [1, 2] : vector<1x22x16xf32> to vector<1xf32>
    %318 = vector.shape_cast %317 : vector<1xf32> to vector<1x1x1xf32>
    %319 = vector.extract %318[0, 0, 0] : f32 from vector<1x1x1xf32>
    %320 = vector.broadcast %319 : f32 to vector<1x1xf32>
    %321 = math.sqrt %311 : vector<1x1xf32>
    %322 = math.sqrt %320 : vector<1x1xf32>
    %323 = arith.addf %321, %322 : vector<1x1xf32>
    %cst_112 = arith.constant 0.0769230798 : f32
    %324 = vector.broadcast %cst_112 : f32 to vector<1x1xf32>
    %325 = arith.mulf %323, %324 : vector<1x1xf32>
    %cst_113 = arith.constant 5.000000e-01 : f32
    %326 = vector.broadcast %cst_113 : f32 to vector<1x1xf32>
    %327 = arith.mulf %326, %108 : vector<1x1xf32>
    %cst_114 = arith.constant 5.000000e-01 : f32
    %328 = vector.broadcast %cst_114 : f32 to vector<1x1xf32>
    %329 = arith.mulf %328, %298 : vector<1x1xf32>
    %330 = arith.addf %327, %329 : vector<1x1xf32>
    %cst_115 = arith.constant 0.00999999977 : f32
    %331 = vector.broadcast %cst_115 : f32 to vector<1x1xf32>
    %332 = arith.mulf %331, %325 : vector<1x1xf32>
    %333 = arith.addf %330, %332 : vector<1x1xf32>
    %334 = vector.shape_cast %333 : vector<1x1xf32> to vector<1x1xf32>
    %335 = vector.broadcast %334 : vector<1x1xf32> to vector<1x128xf32>
    %c0_116 = arith.constant 0 : index
    %c0_117 = arith.constant 0 : index
    %336 = vector.load %arg11[%c0_116, %c0_117] : memref<1x128xf32, #tpu.memory_space<vmem>>, vector<1x128xf32>
    tpu.vector_store %arg11[%c0_116, %c0_117], %335 {strides = array<i32>} : memref<1x128xf32, #tpu.memory_space<vmem>>, vector<1x128xf32>,
    return
  }
}

</mosaic_0001>

<bundles_post_ra>
// kernel: bipn_forward.1
= control target key start
LH: loop header
LB: loop body
LE: loop exit
PB: predicated region body
PF: predicated region fallthrough
CT: control target
= control target key end

     0   :  { %v3996_v2 = vmov 0.0|0.0   ;;  %s4696_s0 = inlined_call_operand.vmem [shape: f32[22,22], index: 0, kind: input, shape index: {}]   ;;  %s4697_s1 = inlined_call_operand.vmem [shape: f32[22,22], index: 1, kind: input, shape index: {}]   ;;  %s4698_s2 = inlined_call_operand.vmem [shape: f32[22,16], index: 2, kind: input, shape index: {}]   ;;  %s4699_s3 = inlined_call_operand.vmem [shape: f32[35,16], index: 3, kind: input, shape index: {}]   ;;  %s4700_s4 = inlined_call_operand.vmem [shape: f32[35,16], index: 4, kind: input, shape index: {}]   ;;  %s4701_s5 = inlined_call_operand.vmem [shape: f32[35,16], index: 5, kind: input, shape index: {}]   ;;  %s4702_s6 = inlined_call_operand.vmem [shape: f32[3,3], index: 6, kind: input, shape index: {}]   ;;  %s4703_s7 = inlined_call_operand.vmem [shape: s32[4,4], index: 7, kind: input, shape index: {}]   ;;  %s4704_s8 = inlined_call_operand.vmem [shape: s32[4,3], index: 8, kind: input, shape index: {}]   ;;  %s4705_s9 = inlined_call_operand.vmem [shape: s32[20,1], index: 9, kind: input, shape index: {}]   ;;  %s4706_s10 = inlined_call_operand.vmem [shape: f32[4,1], index: 10, kind: input, shape index: {}]   ;;  %s4707_s11 = inlined_call_operand.hbm [shape: f32[1,128], index: 11, kind: output, shape index: {}]  }
   0x1   :  { %v39_v0 = vld [vmem:[%s4698_s2] sm:$0xff]  ;;  %v40_v1 = vld [vmem:[%s4698_s2 + $0x8] sm:$0xff]  ;;  %3752 = vmatprep.subr.bf16.mxu0 %v3996_v2  ;;  %3755 = vmatprep.subr.bf16.mxu1 %v3996_v2 }
   0x2   :  { %v3753_v3 = vpack.c.bf16 %v40_v1, %v39_v0 }
   0x3   :  { %16 = vsyncpa [#allocation3], 0  ;;  %vm3997_vm0 = vmmov 0   ;;  %v3998_v4 = vmov 0.0   ;;  %v41_v5 = vld [vmem:[%s4698_s2 + $0x10] sm:$0x3f]  ;;  %v436_v40 = vlaneseq }
   0x4   :  { %3754 = vmatpush3.bf16.msra.mxu0 %v3753_v3  ;;  %3418 = vmatprep.mubr.msk.f32.mxu0 %vm3997_vm0, %v3998_v4  ;;  %vm55_vm1 = vcmask 1045504   ;;  %v42_v6 = vld [vmem:[%s4696_s0] sm:$0xff]  ;;  %vm45_vm2 = vcmask 179200   ;;  %v43_v7 = vld [vmem:[%s4696_s0 + $0x8] sm:$0xff]  ;;  %v44_v8 = vld [vmem:[%s4696_s0 + $0x10] sm:$0x3f] }
   0x5   :  { %3416 = vmatprep.subr.mxu0 %v3998_v4  ;;  %3433 = vmatprep.mubr.msk.f32.mxu1 %vm3997_vm0, %v3998_v4  ;;  %v4117_v16 = vld [vmem:[%s4703_s7] sm:$0xf]  ;;  %v3999_v17 = vmov 1   ;;  %v4000_v19 = vmov 2   ;;  %v4001_v20 = vmov 0   ;;  %v232_v38 = vld [vmem:[%s4697_s1 + $0x8] sm:$0xff] }
   0x6   :  { %3899 = vset.pattern.permute.xlu0 %v3999_v17  ;;  %v434_v18 = vadd.s32 9, %v4117_v16  ;;  %3901 = vset.pattern.permute.xlu1 %v4000_v19  ;;  %v231_v37 = vld [vmem:[%s4697_s1] sm:$0xff]  ;;  %v233_v39 = vld [vmem:[%s4697_s1 + $0x10] sm:$0x3f]  ;;  %v4164_v42 = vand.u32 127, %v436_v40  ;;  %vm607_vm5 = vcmask 1042432  }
   0x7   :  { %598 = vperm.xlu1 %3901, %v4117_v16   ;;  %v4169_v45 = vld [vmem:[%s4704_s8] sm:$0xf]  ;;  %vm603_vm6 = vcmask 23552   ;;  %v420_v58 = vld [vmem:[%s4699_s3 + $0x10] sm:$0xff]  ;;  %v421_v59 = vld [vmem:[%s4699_s3 + $0x18] sm:$0xff]  ;;  %vm681_vm11 = vcmask 130048  }
   0x8   :  { %3417 = vmatpush3.msk.msra.mxu0 %vm55_vm1, %v41_v5  ;;  %518 = vperm.xlu0 %3899, %v434_v18   ;;  %v596_v46 = vld [vmem:[%s4702_s6] sm:$0x7]  ;;  %v1392_v47 = vadd.s32 9, %v4169_v45  ;;  %v425_v60 = vld [vmem:[%s4700_s4 + $0x10] sm:$0xff]  ;;  %v4222_v61 = vpack.c.bf16 %v421_v59, %v420_v58  ;;  %v426_v62 = vld [vmem:[%s4700_s4 + $0x18] sm:$0xff]  ;;  %s4003_s0 = smov 125  }
   0x9   :  { %3419 = vmatmul.mubr.msk.f32.vlgmr.msra.gmra.mrb[0].mxu0 %vm45_vm2, %v42_v6  ;;  %3758 = vmatprep.subr.bf16.mxu0 %v3996_v2  ;;  %v4227_v63 = vpack.c.bf16 %v426_v62, %v425_v60  ;;  %s4004_s29 = smov 126   ;;  %s4005_s8 = smov [#allocation2]  }
   0xa   :  { %3421 = vmatprep.mubr.msk.f32.mxu0 %vm3997_vm0, %v3998_v4  ;;  %s3148_s19 = sshll.u32 %s4005_s8, 4  ;;  %s3149_s19 = int_to_ptr.vmem [resolvable:$true] %s3148_s19 }
   0xb   :  { %3902 = vset.pattern.permute.xlu1 %v4001_v20  ;;  %p3977_p1 = scmp.lt.s32.totalorder %s3149_s19, %s3149_s19 }
   0xc   :  { %3900 = vset.pattern.permute.xlu0 %v4001_v20  ;;  %1406 = vperm.xlu1 %3902, %v4169_v45  }
   0xd   :  { %3422 = vmatmul.mubr.msk.f32.gmra.mrb[2].mxu0 %vm45_vm2, %v43_v7  ;;  %439 = vperm.xlu0 %3900, %v4117_v16  }
   0xe   :  { %3424 = vmatprep.mubr.msk.f32.mxu0 %vm3997_vm0, %v3998_v4 }
  0x10   :  { %3903 = vset.pattern.permute.xlu1 %v3999_v17 }
  0x11   :  { %3425 = vmatmul.mubr.msk.f32.gmra.mrb[4].mxu0 %vm45_vm2, %v44_v8  ;;  %3904 = vset.pattern.permute.xlu0 %v4000_v19 }
  0x12   :  { %3448 = vmatprep.mubr.msk.f32.mxu0 %vm3997_vm0, %v3998_v4  ;;  %1564 = vperm.xlu0 %3904, %v1392_v47  }
  0x13   :  { %1485 = vperm.xlu1 %3903, %v1392_v47   ;;  %v430_v47 = vld [vmem:[%s4701_s5 + $0x10] sm:$0xff] }
  0x16   :  { %3906 = vset.pattern.permute.xlu0 %v4001_v20 }
  0x17   :  { %3905 = vset.pattern.permute.xlu1 %v4001_v20 }
  0x86   :  { %v599_v44 = vpop.permute.xlu1 %598 }
  0x87   :  { %v519_v41 = vpop.permute.xlu0 %518  ;;  %vm600_vm4 = vcmp.eq.s32.totalorder %v4164_v42, %v599_v44  ;;  %v4287_v44 = vld [vmem:[%s4700_s4 + $0x20] sm:$0x7] }
  0x88   :  { %v3178_v49 = vsel %vm600_vm4, 1.0, %v3998_v4  ;;  %vm520_vm7 = vcmp.eq.s32.totalorder %v4164_v42, %v519_v41 }
  0x89   :  { %v3175_v57 = vsel %vm520_vm7, 1.0, %v3998_v4 }
  0x8c   :  { %v440_v43 = vpop.permute.xlu0 %439 }
  0x8d   :  { %vm441_vm3 = vcmp.eq.s32.totalorder %v4164_v42, %v440_v43 }
  0x8e   :  { %v3172_v48 = vsel %vm441_vm3, 1.0, %v3998_v4 }
  0xdc   :  { %v125_v9 = vpop.f32.mrb[0].mxu0 }
  0xdd   :  { %v3420_v10 = vpop.f32.mrb[1].mxu0  ;;  %v139_v21 = vadd.f32 %v125_v9, %v39_v0 }
  0xe0   :  { %v130_v11 = vpop.f32.mrb[2].mxu0 }
  0xe1   :  { %v3423_v12 = vpop.f32.mrb[3].mxu0  ;;  %v3756_v13 = vpack.c.bf16 %v130_v11, %v125_v9  ;;  %v140_v25 = vadd.f32 %v130_v11, %v40_v1 }
  0xe3   :  { %3757 = vmatpush3.bf16.msra.mxu1 %v3756_v13 }
  0xe4   :  { %v135_v14 = vpop.f32.mrb[4].mxu0  ;;  %3431 = vmatprep.subr.mxu1 %v3998_v4 }
  0xe5   :  { %v3426_v15 = vpop.f32.mrb[5].mxu0  ;;  %v141_v29 = vadd.f32 %v135_v14, %v41_v5 }
  0xe7   :  { %3432 = vmatpush3.msk.msra.mxu1 %vm55_vm1, %v135_v14 }
  0xe8   :  { %3434 = vmatmul.mubr.msk.f32.vlgmr.msra.gmra.mrb[0].mxu1 %vm45_vm2, %v42_v6  ;;  %3761 = vmatprep.subr.bf16.mxu1 %v3996_v2  ;;  %v1855_v6 = vld [vmem:[%s4705_s9] sm:$0xff] }
  0xe9   :  { %3436 = vmatprep.mubr.msk.f32.mxu1 %vm3997_vm0, %v3998_v4  ;;  %v1858_v9 = vadd.s32 9, %v1855_v6  ;;  %vm2892_vm9 = vcmp.eq.s32.totalorder %v1855_v6, 0  ;;  %v429_v6 = vld [vmem:[%s4701_s5 + $0x8] sm:$0xff] }
  0xea   :  { %v2895_v13 = vsel %vm2892_vm9, 1, %v4001_v20 }
  0xeb   :  { %1862 = vperm.xlu1 %3905, %v1858_v9   ;;  %v4408_v9 = vshrl.u32 %v436_v40, 7 }
  0xec   :  { %3437 = vmatmul.mubr.msk.f32.gmra.mrb[2].mxu1 %vm45_vm2, %v43_v7  ;;  %v1856_v7 = vld [vmem:[%s4705_s9 + $0x8] sm:$0xff] }
  0xed   :  { %3439 = vmatprep.mubr.msk.f32.mxu1 %vm3997_vm0, %v3998_v4  ;;  %v1859_v11 = vadd.s32 9, %v1856_v7  ;;  %vm2893_vm10 = vcmp.eq.s32.totalorder %v1856_v7, 0  ;;  %v1971_v40 = vadd.s32 16, %v4408_v9 }
  0xee   :  { %v2896_v14 = vsel %vm2893_vm10, 1, %v4001_v20 }
  0xef   :  { %1865 = vperm.xlu1 %3905, %v1859_v11   ;;  %v4413_v11 = vadd.s32 8, %v4408_v9 }
  0xf0   :  { %3440 = vmatmul.mubr.msk.f32.gmra.mrb[4].mxu1 %vm45_vm2, %v44_v8  ;;  %v1857_v8 = vld [vmem:[%s4705_s9 + $0x10] sm:$0xf] }
  0xf1   :  { %3463 = vmatprep.mubr.msk.f32.mxu1 %vm3997_vm0, %v3998_v4  ;;  %v1860_v10 = vadd.s32 9, %v1857_v8  ;;  %vm2894_vm8 = vcmp.eq.s32.totalorder %v1857_v8, 0  ;;  %v1972_v8 = vmul.u32 5, %v4164_v42 }
  0xf2   :  { %v2897_v12 = vsel %vm2894_vm8, 1, %v4001_v20 }
  0xf3   :  { %1868 = vperm.xlu0 %3906, %v1860_v10   ;;  %2899 = vperm.xlu1 %3905, %v2895_v13   ;;  %v1976_v10 = vadd.s32 5, %v1972_v8  ;;  %vm1973_vm7 = vcmp.ge.s32.totalorder %v4408_v9, %v1972_v8  ;;  %vm1974_vm10 = vcmp.ge.s32.totalorder %v4413_v11, %v1972_v8 }
  0xf5   :  { %vm1977_vm8 = vcmp.lt.s32.totalorder %v4408_v9, %v1976_v10 }
  0xf6   :  { %vm1980_vm9 = vmand %vm1973_vm7, %vm1977_vm8 }
  0xf7   :  { %2905 = vperm.xlu0 %3906, %v2897_v12   ;;  %2902 = vperm.xlu1 %3905, %v2896_v14  }
 0x1bb   :  { %v211_v22 = vpop.f32.mrb[0].mxu1 }
 0x1bc   :  { %v225_v23 = vadd.f32 %v211_v22, %v139_v21  ;;  %v3435_v24 = vpop.f32.mrb[1].mxu1 }
 0x1be   :  { %v4125_v30 = vmul.f32 0.33333334, %v225_v23 }
 0x1bf   :  { %v216_v26 = vpop.f32.mrb[2].mxu1 }
 0x1c0   :  { %v226_v27 = vadd.f32 %v216_v26, %v140_v25  ;;  %v3438_v28 = vpop.f32.mrb[3].mxu1  ;;  %v418_v25 = vld [vmem:[%s4699_s3] sm:$0xff]  ;;  %v419_v26 = vld [vmem:[%s4699_s3 + $0x8] sm:$0xff] }
 0x1c2   :  { %v4127_v31 = vmul.f32 0.33333334, %v226_v27 }
 0x1c3   :  { %v221_v32 = vpop.f32.mrb[4].mxu1 }
 0x1c4   :  { %v4131_v33 = vpack.c.bf16 %v4127_v31, %v4125_v30  ;;  %v227_v34 = vadd.f32 %v221_v32, %v141_v29  ;;  %v3441_v35 = vpop.f32.mrb[5].mxu1 }
 0x1c6   :  { %3760 = vmatpush3.bf16.msra.mxu0 %v4131_v33  ;;  %v4135_v36 = vmul.f32 0.33333334, %v227_v34 }
 0x1c7   :  { %3446 = vmatprep.subr.mxu0 %v3998_v4 }
 0x1ca   :  { %3447 = vmatpush3.msk.msra.mxu0 %vm55_vm1, %v4135_v36 }
 0x1cb   :  { %3449 = vmatmul.mubr.msk.f32.vlgmr.msra.gmra.mrb[6].mxu0 %vm45_vm2, %v231_v37  ;;  %3764 = vmatprep.subr.bf16.mxu0 %v3996_v2 }
 0x1cc   :  { %3766 = vmatpush3.bf16.msra.mxu0 %v4131_v33  ;;  %3451 = vmatprep.mubr.msk.f32.mxu0 %vm3997_vm0, %v3998_v4 }
 0x1cd   :  { %3476 = vmatprep.subr.mxu0 %v3998_v4 }
 0x1cf   :  { %3452 = vmatmul.mubr.msk.f32.gmra.mrb[8].mxu0 %vm45_vm2, %v232_v38 }
 0x1d0   :  { %3477 = vmatpush3.msk.msra.mxu0 %vm55_vm1, %v4135_v36  ;;  %3454 = vmatprep.mubr.msk.f32.mxu0 %vm3997_vm0, %v3998_v4 }
 0x1d1   :  { %3490 = vmatprep.subr.mxu0 %v3998_v4 }
 0x1d3   :  { %3455 = vmatmul.mubr.msk.f32.gmra.mrb[10].mxu0 %vm45_vm2, %v233_v39 }
 0x1d4   :  { %3478 = vmatprep.mubr.msk.f32.mxu0 %vm3997_vm0, %v3998_v4 }
 0x1d7   :  { %3479 = vmatmul.mubr.msk.f32.vlgmr.msra.gmra.mrb[12].mxu0 %vm45_vm2, %v3172_v48  ;;  %v431_v48 = vld [vmem:[%s4701_s5 + $0x18] sm:$0xff] }
 0x1d8   :  { %3491 = vmatpush3.msk.msra.mxu0 %vm607_vm5, %v596_v46  ;;  %3492 = vmatprep.mubr.msk.f32.mxu0 %vm3997_vm0, %v3998_v4  ;;  %v4292_v46 = vld [vmem:[%s4699_s3 + $0x20] sm:$0x7]  ;;  %s3972_s3 = scalar_lea.vmem %s3149_s19, 16 }
 0x1d9   :  { %3776 = vmatprep.subr.bf16.mxu0 %v3996_v2  ;;  %p3973_p0 = scmp.ne.s32.totalorder %s3149_s19, %s3972_s3 }
 0x1db   :  { %3493 = vmatmul.mubr.msk.f32.vlgmr.msra.gmra.mrb[14].mxu0 %vm603_vm6, %v3178_v49  ;;  %v4314_v49 = vpack.c.bf16 %v431_v48, %v430_v47 }
 0x1dc   :  { %3518 = vmatprep.mubr.msk.f32.mxu0 %vm3997_vm0, %v3998_v4  ;;  %3778 = vmatpush3.bf16.msra.mxu0 %v4227_v63 }
 0x1dd   :  { %3779 = vmatprep.subr.bf16.mxu0 %v3996_v2 }
 0x29e   :  { %v312_v50 = vpop.f32.mrb[6].mxu0 }
 0x29f   :  { %v3450_v51 = vpop.f32.mrb[7].mxu0  ;;  %v326_v15 = vadd.f32 %v312_v50, %v4125_v30  ;;  %v423_v30 = vld [vmem:[%s4700_s4] sm:$0xff] }
 0x2a2   :  { %v317_v52 = vpop.f32.mrb[8].mxu0 }
 0x2a3   :  { %v3762_v53 = vpack.c.bf16 %v317_v52, %v312_v50  ;;  %v3453_v54 = vpop.f32.mrb[9].mxu0  ;;  %v327_v21 = vadd.f32 %v317_v52, %v4127_v31  ;;  %v424_v31 = vld [vmem:[%s4700_s4 + $0x8] sm:$0xff]  ;;  %v1407_v50 = vpop.permute.xlu1 %1406  ;;  %s3976_s4 = scalar_lea.vmem %s3149_s19, 32 }
 0x2a4   :  { %vm1408_vm12 = vcmp.eq.s32.totalorder %v4164_v42, %v1407_v50  ;;  %v4552_v50 = vld [vmem:[%s4702_s6 + $0x2] ss:$0 sm:$0xff]  ;;  %s4002_s6 = smov 127   ;;  %p3978_p2 = scmp.lt.s32.totalorder %s3976_s4, %s3972_s3 }
 0x2a5   :  { %3763 = vmatpush3.bf16.msra.mxu1 %v3762_v53  ;;  %v3197_v51 = vsel %vm1408_vm12, 1.0, %v3998_v4  ;;  %vm1978_vm12 = vcmp.lt.s32.totalorder %v4413_v11, %v1976_v10 }
 0x2a6   :  { %v322_v55 = vpop.f32.mrb[10].mxu0  ;;  %3461 = vmatprep.subr.mxu1 %v3998_v4  ;;  %p3979_p3 = por %p3978_p2, %p3977_p1 }
 0x2a7   :  { %v3456_v56 = vpop.f32.mrb[11].mxu0  ;;  %v328_v27 = vadd.f32 %v322_v55, %v4135_v36  ;;  %v1486_v52 = vpop.permute.xlu1 %1485 }
 0x2a8   :  { %vm1487_vm13 = vcmp.eq.s32.totalorder %v4164_v42, %v1486_v52  ;;  %p3980_p4 = pnand %p3979_p3, %p3973_p0 }
 0x2a9   :  { %3462 = vmatpush3.msk.msra.mxu1 %vm55_vm1, %v322_v55  ;;  %v4344_v53 = vsel %vm1487_vm13, 1.0, %v3998_v4  ;;  %v1565_v55 = vpop.permute.xlu0 %1564  ;;  %vm1999_vm13 = vcmask 1043456  }
 0x2aa   :  { %3464 = vmatmul.mubr.msk.f32.vlgmr.msra.gmra.mrb[6].mxu1 %vm45_vm2, %v231_v37  ;;  %3767 = vmatprep.subr.bf16.mxu1 %v3996_v2  ;;  %v4233_v0 = vpop.f32.mrb[12].mxu0  ;;  %vm1566_vm14 = vcmp.eq.s32.totalorder %v4164_v42, %v1565_v55 }
 0x2ab   :  { %3769 = vmatpush3.bf16.msra.mxu1 %v4131_v33  ;;  %3466 = vmatprep.mubr.msk.f32.mxu1 %vm3997_vm0, %v3998_v4  ;;  %v3480_v1 = vpop.f32.mrb[13].mxu0  ;;  %v4367_v56 = vsel %vm1566_vm14, 1.0, %v3998_v4  ;;  %vm1989_vm14 = vcmask 31744  }
 0x2ac   :  { %3485 = vmatprep.subr.mxu1 %v3998_v4 }
 0x2ad   :  { %v1869_v60 = vpop.permute.xlu0 %1868 }
 0x2ae   :  { %3467 = vmatmul.mubr.msk.f32.gmra.mrb[8].mxu1 %vm45_vm2, %v232_v38  ;;  %v4235_v3 = vpop.f32.mrb[14].mxu0  ;;  %v4266_v38 = vpack.c.bf16 %v419_v26, %v418_v25  ;;  %vm1872_vm4 = vcmp.eq.s32.totalorder %v4164_v42, %v1869_v60 }
 0x2af   :  { %3486 = vmatpush3.msk.msra.mxu1 %vm55_vm1, %v4135_v36  ;;  %3469 = vmatprep.mubr.msk.f32.mxu1 %vm3997_vm0, %v3998_v4  ;;  %v3494_v5 = vpop.f32.mrb[15].mxu0  ;;  %v3214_v1 = vsel %vm1872_vm4, 1.0, %v3998_v4  ;;  %vm1979_vm4 = vcmp.lt.s32.totalorder %v1971_v40, %v1976_v10 }
 0x2b0   :  { %3770 = vmatprep.subr.bf16.mxu1 %v3996_v2  ;;  %v428_v5 = vld [vmem:[%s4701_s5] sm:$0xff] }
 0x2b1   :  { %v4402_v7 = vpack.c.bf16 %v429_v6, %v428_v5 }
 0x2b2   :  { %3470 = vmatmul.mubr.msk.f32.gmra.mrb[10].mxu1 %vm45_vm2, %v233_v39  ;;  %v4268_v39 = vpack.c.bf16 %v424_v31, %v423_v30 }
 0x2b3   :  { %3487 = vmatprep.mubr.msk.f32.mxu1 %vm3997_vm0, %v3998_v4 }
 0x2b6   :  { %3488 = vmatmul.mubr.msk.f32.vlgmr.msra.gmra.mrb[12].mxu1 %vm45_vm2, %v3175_v57  ;;  %v1863_v57 = vpop.permute.xlu1 %1862 }
 0x2b7   :  { %3499 = vmatprep.mubr.msk.f32.mxu1 %vm3997_vm0, %v3998_v4  ;;  %3772 = vmatpush3.bf16.msra.mxu1 %v4222_v61  ;;  %vm1870_vm15 = vcmp.eq.s32.totalorder %v4164_v42, %v1863_v57 }
 0x2b8   :  { %3773 = vmatprep.subr.bf16.mxu1 %v3996_v2  ;;  %v3212_v58 = vsel %vm1870_vm15, 1.0, %v3998_v4  ;;  %vm1981_vm15 = vmand %vm1974_vm10, %vm1978_vm12 }
 0x2ba   :  { %v1866_v59 = vpop.permute.xlu1 %1865 }
 0x2bb   :  { %vm1871_vm3 = vcmp.eq.s32.totalorder %v4164_v42, %v1866_v59 }
 0x2bc   :  { %v3213_v62 = vsel %vm1871_vm3, 1.0, %v3998_v4  ;;  %vm1975_vm3 = vcmp.ge.s32.totalorder %v1971_v40, %v1972_v8 }
 0x2bd   :  { %vm1982_vm7 = vmand %vm1975_vm3, %vm1979_vm4  ;;  %vm3086_vm3 = vcmask 128000  }
 0x2be   :  { %v3221_v25 = vsel %vm1982_vm7, 1.0, %v3998_v4 }
 0x37d   :  { %v398_v17 = vpop.f32.mrb[6].mxu1 }
 0x37e   :  { %v412_v18 = vadd.f32 %v398_v17, %v326_v15  ;;  %v3465_v19 = vpop.f32.mrb[7].mxu1 }
 0x380   :  { %v415_v28 = vmul.f32 0.33333334, %v412_v18  ;;  %v3219_v18 = vsel %vm1980_vm9, 1.0, %v3998_v4 }
 0x381   :  { %v403_v22 = vpop.f32.mrb[8].mxu1 }
 0x382   :  { %v413_v23 = vadd.f32 %v403_v22, %v327_v21  ;;  %v3468_v24 = vpop.f32.mrb[9].mxu1  ;;  %v3220_v22 = vsel %vm1981_vm15, 1.0, %v3998_v4  ;;  %vm2920_vm15 = vcmask 162816  }
 0x384   :  { %v416_v29 = vmul.f32 0.33333334, %v413_v23 }
 0x385   :  { %v408_v32 = vpop.f32.mrb[10].mxu1 }
 0x386   :  { %v4264_v34 = vpack.c.bf16 %v416_v29, %v415_v28  ;;  %v414_v35 = vadd.f32 %v408_v32, %v328_v27  ;;  %v3471_v37 = vpop.f32.mrb[11].mxu1 }
 0x387   :  { %v4446_v37 = vld [vmem:[%s4701_s5 + $0x20] sm:$0x7] }
 0x388   :  { %v4355_v54 = vmul.f32 0.33333334, %v414_v35 }
 0x389   :  { %v4270_v41 = vpop.f32.mrb[12].mxu1 }
 0x38a   :  { %v3489_v43 = vpop.f32.mrb[13].mxu1  ;;  %3500 = vmatmul.mubr.msk.f32.vlgmr.msra.gmra.mrb[14].mxu1 %vm681_vm11, %v4270_v41  ;;  %3519 = vmatmul.mubr.msk.f32.vlgmr.msra.gmra.mrb[16].mxu0 %vm681_vm11, %v4270_v41 }
 0x38b   :  { %3775 = vmatpush3.bf16.msra.mxu1 %v4266_v38  ;;  %3781 = vmatpush3.bf16.msra.mxu0 %v4268_v39 }
 0x38c   :  { %3506 = vmatprep.mubr.msk.f32.mxu1 %vm3997_vm0, %v3998_v4  ;;  %3525 = vmatprep.mubr.msk.f32.mxu0 %vm3997_vm0, %v3998_v4 }
 0x38d   :  { %3528 = vmatprep.subr.mxu0 %v3998_v4  ;;  %3509 = vmatprep.subr.mxu1 %v3998_v4 }
 0x392   :  { %3507 = vmatmul.mubr.msk.f32.vlgmr.msra.gmra.mrb[14].mxu1 %vm681_vm11, %v4233_v0  ;;  %3526 = vmatmul.mubr.msk.f32.vlgmr.msra.gmra.mrb[16].mxu0 %vm681_vm11, %v4233_v0 }
 0x393   :  { %3529 = vmatpush3.msk.msra.mxu0 %vm607_vm5, %v4287_v44  ;;  %3510 = vmatpush3.msk.msra.mxu1 %vm607_vm5, %v4292_v46 }
 0x394   :  { %3511 = vmatprep.mubr.msk.f32.mxu1 %vm3997_vm0, %v3998_v4  ;;  %3530 = vmatprep.mubr.msk.f32.mxu0 %vm3997_vm0, %v3998_v4 }
 0x395   :  { %3788 = vmatprep.subr.bf16.mxu0 %v3996_v2  ;;  %3782 = vmatprep.subr.bf16.mxu1 %v3996_v2 }
 0x39a   :  { %3512 = vmatmul.mubr.msk.f32.vlgmr.msra.gmra.mrb[14].mxu1 %vm603_vm6, %v4235_v3  ;;  %3531 = vmatmul.mubr.msk.f32.vlgmr.msra.gmra.mrb[16].mxu0 %vm603_vm6, %v4235_v3 }
 0x39b   :  { %3790 = vmatpush3.bf16.msra.mxu0 %v4131_v33  ;;  %3784 = vmatpush3.bf16.msra.mxu1 %v4314_v49 }
 0x39c   :  { %3537 = vmatprep.mubr.msk.f32.mxu1 %vm3997_vm0, %v3998_v4  ;;  %3556 = vmatprep.subr.mxu0 %v3998_v4 }
 0x39d   :  { %3558 = vmatprep.mubr.msk.f32.mxu0 %vm3997_vm0, %v3998_v4  ;;  %3785 = vmatprep.subr.bf16.mxu1 %v3996_v2 }
 0x39e   :  { %3538 = vmatmul.mubr.msk.f32.vlgmr.msra.gmra.mrb[16].mxu1 %vm681_vm11, %v4270_v41 }
 0x39f   :  { %3557 = vmatpush3.msk.msra.mxu0 %vm55_vm1, %v4135_v36  ;;  %3544 = vmatprep.mubr.msk.f32.mxu1 %vm3997_vm0, %v3998_v4 }
 0x3a0   :  { %3559 = vmatmul.mubr.msk.f32.vlgmr.msra.gmra.mrb[18].mxu0 %vm45_vm2, %v3197_v51  ;;  %3791 = vmatprep.subr.bf16.mxu0 %v3996_v2 }
 0x3a1   :  { %3793 = vmatpush3.bf16.msra.mxu0 %v4131_v33  ;;  %3567 = vmatprep.mubr.msk.f32.mxu0 %vm3997_vm0, %v3998_v4 }
 0x3a2   :  { %3565 = vmatprep.subr.mxu0 %v3998_v4  ;;  %3787 = vmatpush3.bf16.msra.mxu1 %v4402_v7 }
 0x3a3   :  { %3547 = vmatprep.subr.mxu1 %v3998_v4 }
 0x3a5   :  { %3566 = vmatpush3.msk.msra.mxu0 %vm55_vm1, %v4135_v36 }
 0x3a6   :  { %3797 = vmatprep.subr.bf16.mxu0 %v3996_v2  ;;  %3568 = vmatmul.mubr.msk.f32.vlgmr.msra.gmra.mrb[20].mxu0 %vm45_vm2, %v4344_v53 }
 0x3a7   :  { %3799 = vmatpush3.bf16.msra.mxu0 %v4264_v34  ;;  %3585 = vmatprep.mubr.msk.f32.mxu0 %vm3997_vm0, %v3998_v4 }
 0x3a8   :  { %3583 = vmatprep.subr.mxu0 %v3998_v4 }
 0x3ab   :  { %3584 = vmatpush3.msk.msra.mxu0 %vm55_vm1, %v4355_v54 }
 0x3ac   :  { %3586 = vmatmul.mubr.msk.f32.vlgmr.msra.gmra.mrb[22].mxu0 %vm45_vm2, %v3197_v51  ;;  %3803 = vmatprep.subr.bf16.mxu0 %v3996_v2 }
 0x3ad   :  { %3805 = vmatpush3.bf16.msra.mxu0 %v4264_v34  ;;  %3603 = vmatprep.mubr.msk.f32.mxu0 %vm3997_vm0, %v3998_v4 }
 0x3ae   :  { %3601 = vmatprep.subr.mxu0 %v3998_v4 }
 0x3b1   :  { %3602 = vmatpush3.msk.msra.mxu0 %vm55_vm1, %v4355_v54 }
 0x3b2   :  { %3806 = vmatprep.subr.bf16.mxu0 %v3996_v2  ;;  %3604 = vmatmul.mubr.msk.f32.vlgmr.msra.gmra.mrb[24].mxu0 %vm45_vm2, %v4367_v56 }
 0x3b3   :  { %3808 = vmatpush3.bf16.msra.mxu0 %v4131_v33  ;;  %3612 = vmatprep.mubr.msk.f32.mxu0 %vm3997_vm0, %v3998_v4 }
 0x3b4   :  { %3610 = vmatprep.subr.mxu0 %v3998_v4 }
 0x3b7   :  { %3611 = vmatpush3.msk.msra.mxu0 %vm55_vm1, %v4135_v36 }
 0x3b8   :  { %3621 = vmatprep.subr.mxu0 %v3998_v4  ;;  %3613 = vmatmul.mubr.msk.f32.vlgmr.msra.gmra.mrb[26].mxu0 %vm45_vm2, %v3212_v58 }
 0x3b9   :  { %3615 = vmatprep.mubr.msk.f32.mxu0 %vm3997_vm0, %v3998_v4 }
 0x3bc   :  { %3616 = vmatmul.mubr.msk.f32.gmra.mrb[28].mxu0 %vm45_vm2, %v3213_v62 }
 0x3bd   :  { %3618 = vmatprep.mubr.msk.f32.mxu0 %vm3997_vm0, %v3998_v4 }
 0x3c0   :  { %3619 = vmatmul.mubr.msk.f32.gmra.mrb[30].mxu0 %vm45_vm2, %v3214_v1 }
 0x3c1   :  { %3623 = vmatprep.mubr.msk.f32.mxu0 %vm3997_vm0, %v3998_v4 }
 0x46d   :  { %v900_v12 = vpop.f32.mrb[14].mxu1  ;;  %v4415_v13 = vpop.f32.mrb[16].mxu0 }
 0x46e   :  { %v3185_v14 = vmul.f32 -1.442695, %v900_v12  ;;  %v3513_v15 = vpop.f32.mrb[15].mxu1  ;;  %v3532_v17 = vpop.f32.mrb[17].mxu0 }
 0x470   :  { %3907 = vpow2.f32 %v3185_v14 }
 0x473   :  { %v1480_v19 = vpop.f32.mrb[18].mxu0 }
 0x474   :  { %v3560_v21 = vpop.f32.mrb[19].mxu0  ;;  %3622 = vmatpush3.msk.msra.mxu0 %vm1999_vm13, %v1480_v19 }
 0x475   :  { %3624 = vmatmul.mubr.msk.f32.vlgmr.msra.gmra.mrb[32].mxu0 %vm1989_vm14, %v3219_v18  ;;  %3815 = vmatprep.subr.bf16.mxu0 %v3996_v2 }
 0x476   :  { %3626 = vmatprep.mubr.msk.f32.mxu0 %vm3997_vm0, %v3998_v4  ;;  %3817 = vmatpush3.bf16.msra.mxu0 %v4227_v63 }
 0x477   :  { %3818 = vmatprep.subr.bf16.mxu0 %v3996_v2 }
 0x479   :  { %3627 = vmatmul.mubr.msk.f32.gmra.mrb[34].mxu0 %vm1989_vm14, %v3220_v22  ;;  %v4430_v23 = vpop.f32.mrb[20].mxu0 }
 0x47a   :  { %v3908_v24 = vpop.eup %3907  ;;  %3629 = vmatprep.mubr.msk.f32.mxu0 %vm3997_vm0, %v3998_v4  ;;  %v3569_v26 = vpop.f32.mrb[21].mxu0 }
 0x47b   :  { %v908_v27 = vadd.f32 1.0, %v3908_v24  ;;  %v435_v24 = vcvt.s32.f32 %v4117_v16 }
 0x47d   :  { %3909 = vrcp.f32 %v908_v27  ;;  %3630 = vmatmul.mubr.msk.f32.gmra.mrb[36].mxu0 %vm1989_vm14, %v3221_v25 }
 0x47e   :  { %3673 = vmatprep.mubr.msk.f32.mxu0 %vm3997_vm0, %v3998_v4 }
 0x47f   :  { %v1711_v63 = vpop.f32.mrb[22].mxu0 }
 0x480   :  { %v4438_v28 = vadd.f32 %v1711_v63, %v1480_v19  ;;  %v3587_v29 = vpop.f32.mrb[23].mxu0 }
 0x485   :  { %v4440_v30 = vpop.f32.mrb[24].mxu0 }
 0x486   :  { %v3605_v31 = vpop.f32.mrb[25].mxu0 }
 0x487   :  { %v3910_v32 = vpop.eup %3909 }
 0x488   :  { %v1131_v35 = vmul.f32 %v3910_v32, %v4233_v0 }
 0x48a   :  { %3545 = vmatmul.mubr.msk.f32.vlgmr.msra.gmra.mrb[16].mxu1 %vm681_vm11, %v1131_v35  ;;  %v1370_v35 = vsub.f32 1.0, %v435_v24 }
 0x48b   :  { %3548 = vmatpush3.msk.msra.mxu1 %vm607_vm5, %v4446_v37  ;;  %3549 = vmatprep.mubr.msk.f32.mxu1 %vm3997_vm0, %v3998_v4  ;;  %v4454_v43 = vpop.f32.mrb[26].mxu0 }
 0x48c   :  { %3794 = vmatprep.subr.bf16.mxu1 %v3996_v2  ;;  %3674 = vmatmul.mubr.msk.f32.vlgmr.msra.gmra.mrb[38].mxu0 %vm681_vm11, %v4454_v43  ;;  %v3614_v0 = vpop.f32.mrb[27].mxu0 }
 0x48d   :  { %3676 = vmatprep.mubr.msk.f32.mxu0 %vm3997_vm0, %v3998_v4  ;;  %3820 = vmatpush3.bf16.msra.mxu0 %v4268_v39  ;;  %v3190_v39 = vmul.f32 -1.442695, %v4415_v13  ;;  %v4612_v13 = vpop.permute.xlu1 %2899 }
 0x48e   :  { %3695 = vmatprep.subr.mxu0 %v3998_v4 }
 0x48f   :  { %v4467_v47 = vpop.f32.mrb[28].mxu0  ;;  %3911 = vpow2.f32 %v3190_v39 }
 0x490   :  { %v3617_v48 = vpop.f32.mrb[29].mxu0  ;;  %3677 = vmatmul.mubr.msk.f32.gmra.mrb[40].mxu0 %vm681_vm11, %v4467_v47 }
 0x491   :  { %3679 = vmatprep.mubr.msk.f32.mxu0 %vm3997_vm0, %v3998_v4 }
 0x492   :  { %3550 = vmatmul.mubr.msk.f32.vlgmr.msra.gmra.mrb[16].mxu1 %vm603_vm6, %v4235_v3 }
 0x493   :  { %3796 = vmatpush3.bf16.msra.mxu1 %v4131_v33  ;;  %3576 = vmatprep.mubr.msk.f32.mxu1 %vm3997_vm0, %v3998_v4  ;;  %v4476_v3 = vpop.f32.mrb[30].mxu0 }
 0x494   :  { %3574 = vmatprep.subr.mxu1 %v3998_v4  ;;  %v3620_v33 = vpop.f32.mrb[31].mxu0  ;;  %3680 = vmatmul.mubr.msk.f32.gmra.mrb[42].mxu0 %vm681_vm11, %v4476_v3 }
 0x495   :  { %3686 = vmatprep.mubr.msk.f32.mxu0 %vm3997_vm0, %v3998_v4 }
 0x497   :  { %3575 = vmatpush3.msk.msra.mxu1 %vm55_vm1, %v4135_v36 }
 0x498   :  { %3577 = vmatmul.mubr.msk.f32.vlgmr.msra.gmra.mrb[18].mxu1 %vm45_vm2, %v4367_v56  ;;  %3800 = vmatprep.subr.bf16.mxu1 %v3996_v2 }
 0x499   :  { %3802 = vmatpush3.bf16.msra.mxu1 %v4264_v34  ;;  %3594 = vmatprep.mubr.msk.f32.mxu1 %vm3997_vm0, %v3998_v4 }
 0x49a   :  { %3592 = vmatprep.subr.mxu1 %v3998_v4 }
 0x49d   :  { %3593 = vmatpush3.msk.msra.mxu1 %vm55_vm1, %v4355_v54  ;;  %vm1352_vm1 = vcmask 125952  }
 0x49e   :  { %3595 = vmatmul.mubr.msk.f32.vlgmr.msra.gmra.mrb[20].mxu1 %vm45_vm2, %v4344_v53  ;;  %3809 = vmatprep.subr.bf16.mxu1 %v3996_v2  ;;  %vm1393_vm2 = vcmp.ne.s32.totalorder %v4169_v45, 0 }
 0x49f   :  { %3811 = vmatpush3.bf16.msra.mxu1 %v4222_v61  ;;  %3636 = vmatprep.mubr.msk.f32.mxu1 %vm3997_vm0, %v3998_v4  ;;  %v4609_v12 = vsel %vm1393_vm2, 1, %v4001_v20 }
 0x4a0   :  { %3812 = vmatprep.subr.bf16.mxu1 %v3996_v2 }
 0x4a2   :  { %3637 = vmatmul.mubr.msk.f32.vlgmr.msra.gmra.mrb[22].mxu1 %vm681_vm11, %v4454_v43 }
 0x4a3   :  { %3639 = vmatprep.mubr.msk.f32.mxu1 %vm3997_vm0, %v3998_v4  ;;  %3814 = vmatpush3.bf16.msra.mxu1 %v4266_v38 }
 0x4a4   :  { %3658 = vmatprep.subr.mxu1 %v3998_v4 }
 0x4a6   :  { %3640 = vmatmul.mubr.msk.f32.gmra.mrb[24].mxu1 %vm681_vm11, %v4467_v47 }
 0x4a7   :  { %3642 = vmatprep.mubr.msk.f32.mxu1 %vm3997_vm0, %v3998_v4 }
 0x4aa   :  { %3643 = vmatmul.mubr.msk.f32.gmra.mrb[26].mxu1 %vm681_vm11, %v4476_v3 }
 0x4ab   :  { %3649 = vmatprep.mubr.msk.f32.mxu1 %vm3997_vm0, %v3998_v4 }
 0x548   :  { %v4512_v36 = vpop.f32.mrb[32].mxu0 }
 0x549   :  { %3650 = vmatmul.mubr.msk.f32.vlgmr.msra.gmra.mrb[22].mxu1 %vm681_vm11, %v4512_v36  ;;  %3687 = vmatmul.mubr.msk.f32.vlgmr.msra.gmra.mrb[38].mxu0 %vm681_vm11, %v4512_v36  ;;  %v3625_v61 = vpop.f32.mrb[33].mxu0 }
 0x54a   :  { %3652 = vmatprep.mubr.msk.f32.mxu1 %vm3997_vm0, %v3998_v4  ;;  %3689 = vmatprep.mubr.msk.f32.mxu0 %vm3997_vm0, %v3998_v4 }
 0x54b   :  { %3659 = vmatpush3.msk.msra.mxu1 %vm607_vm5, %v4292_v46  ;;  %3696 = vmatpush3.msk.msra.mxu0 %vm607_vm5, %v4287_v44 }
 0x54c   :  { %v4526_v34 = vpop.f32.mrb[34].mxu0  ;;  %3821 = vmatprep.subr.bf16.mxu1 %v3996_v2  ;;  %3827 = vmatprep.subr.bf16.mxu0 %v3996_v2 }
 0x54d   :  { %3653 = vmatmul.mubr.msk.f32.gmra.mrb[24].mxu1 %vm681_vm11, %v4526_v34  ;;  %3690 = vmatmul.mubr.msk.f32.gmra.mrb[40].mxu0 %vm681_vm11, %v4526_v34  ;;  %v3628_v38 = vpop.f32.mrb[35].mxu0 }
 0x54e   :  { %3655 = vmatprep.mubr.msk.f32.mxu1 %vm3997_vm0, %v3998_v4  ;;  %3692 = vmatprep.mubr.msk.f32.mxu0 %vm3997_vm0, %v3998_v4 }
 0x550   :  { %v4539_v44 = vpop.f32.mrb[36].mxu0 }
 0x551   :  { %3656 = vmatmul.mubr.msk.f32.gmra.mrb[26].mxu1 %vm681_vm11, %v4539_v44  ;;  %3693 = vmatmul.mubr.msk.f32.gmra.mrb[42].mxu0 %vm681_vm11, %v4539_v44  ;;  %v3631_v46 = vpop.f32.mrb[37].mxu0 }
 0x552   :  { %3660 = vmatprep.mubr.msk.f32.mxu1 %vm3997_vm0, %v3998_v4  ;;  %3697 = vmatprep.mubr.msk.f32.mxu0 %vm3997_vm0, %v3998_v4 }
 0x555   :  { %3661 = vmatmul.mubr.msk.f32.vlgmr.msra.gmra.mrb[22].mxu1 %vm603_vm6, %v4552_v50  ;;  %3698 = vmatmul.mubr.msk.f32.vlgmr.msra.gmra.mrb[38].mxu0 %vm603_vm6, %v4552_v50 }
 0x556   :  { %3663 = vmatprep.mubr.msk.f32.mxu1 %vm3997_vm0, %v3998_v4  ;;  %3700 = vmatprep.mubr.msk.f32.mxu0 %vm3997_vm0, %v3998_v4 }
 0x557   :  { %3823 = vmatpush3.bf16.msra.mxu1 %v4314_v49  ;;  %v3912_v49 = vpop.eup %3911 }
 0x558   :  { %3824 = vmatprep.subr.bf16.mxu1 %v3996_v2  ;;  %v1128_v2 = vadd.f32 1.0, %v3912_v49 }
 0x559   :  { %3664 = vmatmul.mubr.msk.f32.gmra.mrb[24].mxu1 %vm603_vm6, %v4552_v50  ;;  %3701 = vmatmul.mubr.msk.f32.gmra.mrb[40].mxu0 %vm603_vm6, %v4552_v50 }
 0x55a   :  { %3666 = vmatprep.mubr.msk.f32.mxu1 %vm3997_vm0, %v3998_v4  ;;  %3703 = vmatprep.mubr.msk.f32.mxu0 %vm3997_vm0, %v3998_v4  ;;  %3913 = vrcp.f32 %v1128_v2 }
 0x55d   :  { %3667 = vmatmul.mubr.msk.f32.gmra.mrb[26].mxu1 %vm603_vm6, %v4552_v50  ;;  %3704 = vmatmul.mubr.msk.f32.gmra.mrb[42].mxu0 %vm603_vm6, %v4552_v50 }
 0x55e   :  { %3710 = vmatprep.mubr.msk.f32.mxu1 %vm3997_vm0, %v3998_v4  ;;  %3749 = vmatprep.mubr.msk.f32.mxu0 %vm3997_vm0, %v3998_v4 }
 0x561   :  { %3711 = vmatmul.mubr.msk.f32.vlgmr.msra.gmra.mrb[28].mxu1 %vm681_vm11, %v4454_v43 }
 0x562   :  { %3713 = vmatprep.mubr.msk.f32.mxu1 %vm3997_vm0, %v3998_v4  ;;  %3826 = vmatpush3.bf16.msra.mxu1 %v4402_v7 }
 0x563   :  { %3732 = vmatprep.subr.mxu1 %v3998_v4 }
 0x564   :  { %v3914_v57 = vpop.eup %3913 }
 0x565   :  { %3714 = vmatmul.mubr.msk.f32.gmra.mrb[30].mxu1 %vm681_vm11, %v4467_v47  ;;  %v1344_v51 = vpop.f32.mrb[16].mxu1 }
 0x566   :  { %3915 = vtanh.f32 %v1344_v51  ;;  %v3551_v52 = vpop.f32.mrb[17].mxu1  ;;  %3716 = vmatprep.mubr.msk.f32.mxu1 %vm3997_vm0, %v3998_v4 }
 0x569   :  { %3717 = vmatmul.mubr.msk.f32.gmra.mrb[32].mxu1 %vm681_vm11, %v4476_v3 }
 0x56a   :  { %3723 = vmatprep.mubr.msk.f32.mxu1 %vm3997_vm0, %v3998_v4 }
 0x56b   :  { %v4594_v53 = vpop.f32.mrb[18].mxu1 }
 0x56c   :  { %v3005_v54 = vadd.f32 %v4440_v30, %v4594_v53  ;;  %v3578_v55 = vpop.f32.mrb[19].mxu1 }
 0x56e   :  { %v3018_v56 = vmul.f32 %v3005_v54, %v4438_v28 }
 0x570   :  { %v3916_v58 = vpop.eup %3915  ;;  %v3019_v59 = vsel %vm1352_vm1, %v3018_v56, 0.0 }
 0x571   :  { %v1781_v60 = vpop.f32.mrb[20].mxu1  ;;  %3020 = vadd.xlane.f32.xlu0 %v3019_v59  ;;  %v1350_v62 = vmul.f32 %v3916_v58, %v3914_v57 }
 0x572   :  { %v3004_v1 = vadd.f32 %v1781_v60, %v4430_v23  ;;  %v3596_v5 = vpop.f32.mrb[21].mxu1 }
 0x573   :  { %v1351_v6 = vmul.f32 %v1350_v62, %v4270_v41  ;;  %v4614_v41 = vpop.permute.xlu1 %2902 }
 0x574   :  { %v3014_v7 = vmul.f32 %v3004_v1, %v4438_v28 }
 0x575   :  { %v1353_v8 = vsel %vm1352_vm1, %v1351_v6, 0.0 }
 0x576   :  { %1354 = vadd.xlane.f32.xlu1 %v1353_v8  ;;  %v3015_v10 = vsel %vm1352_vm1, %v3014_v7, 0.0 }
 0x57a   :  { %3016 = vadd.xlane.f32.xlu1 %v3015_v10 }
 0x58b   :  { %1395 = vrot.lane.b32.xlu1 %v4609_v12, %s4002_s6 }
 0x603   :  { %v1355_v14 = vpop.xlane.xlu1 %1354 }
 0x604   :  { %v3195_v15 = vmul.f32 -1.442695, %v1355_v14 }
 0x606   :  { %3917 = vpow2.f32 %v3195_v15 }
 0x610   :  { %v3918_v17 = vpop.eup %3917 }
 0x611   :  { %v1359_v40 = vadd.f32 1.0, %v3918_v17 }
 0x613   :  { %3919 = vrcp.f32 %v1359_v40 }
 0x61d   :  { %v3920_v18 = vpop.eup %3919 }
 0x61e   :  { %3921 = vlog2.f32 %v3920_v18  ;;  %v1365_v19 = vsub.f32 1.0, %v3920_v18 }
 0x620   :  { %3923 = vlog2.f32 %v1365_v19 }
 0x628   :  { %v3922_v21 = vpop.eup %3921  ;;  %v2335_v20 = vpop.f32.mrb[22].mxu1 }
 0x629   :  { %v2596_v22 = vpop.f32.mrb[38].mxu0  ;;  %v3237_v25 = vmul.f32 -1.442695, %v2335_v20  ;;  %v3662_v26 = vpop.f32.mrb[23].mxu1  ;;  %v1363_v28 = vmul.f32 0.6931472, %v3922_v21 }
 0x62a   :  { %v3699_v27 = vpop.f32.mrb[39].mxu0  ;;  %v3924_v63 = vpop.eup %3923  ;;  %v3250_v5 = vmul.f32 -1.442695, %v2596_v22  ;;  %v2913_v22 = vmul.u32 5, %v4408_v9 }
 0x62b   :  { %3925 = vpow2.f32 %v3237_v25  ;;  %v1367_v29 = vmul.f32 0.6931472, %v3924_v63  ;;  %v1364_v32 = vmax.f32 %v1363_v28, -100.0  ;;  %v2906_v9 = vpop.permute.xlu0 %2905 }
 0x62c   :  { %v2340_v30 = vpop.f32.mrb[24].mxu1  ;;  %v2601_v31 = vpop.f32.mrb[40].mxu0  ;;  %v2915_v63 = vadd.s32 5, %v2913_v22  ;;  %vm2914_vm8 = vcmp.ge.s32.totalorder %v4164_v42, %v2913_v22  ;;  %vm2909_vm14 = vcmp.eq.s32.totalorder %v2906_v9, 1 }
 0x62d   :  { %v3238_v43 = vmul.f32 -1.442695, %v2340_v30  ;;  %v3665_v0 = vpop.f32.mrb[25].mxu1  ;;  %v3702_v47 = vpop.f32.mrb[41].mxu0  ;;  %v1368_v48 = vmax.f32 %v1367_v29, -100.0  ;;  %v1369_v61 = vmul.f32 %v1364_v32, %v435_v24 }
 0x62e   :  { %v3251_v6 = vmul.f32 -1.442695, %v2601_v31  ;;  %vm2916_vm9 = vcmp.lt.s32.totalorder %v4164_v42, %v2915_v63 }
 0x62f   :  { %3927 = vpow2.f32 %v3238_v43  ;;  %v1371_v16 = vmul.f32 %v1370_v35, %v1368_v48  ;;  %vm2917_vm12 = vmand %vm2914_vm8, %vm2916_vm9 }
 0x630   :  { %v2345_v3 = vpop.f32.mrb[26].mxu1  ;;  %v2606_v33 = vpop.f32.mrb[42].mxu0 }
 0x631   :  { %v3239_v38 = vmul.f32 -1.442695, %v2345_v3  ;;  %v3668_v39 = vpop.f32.mrb[27].mxu1  ;;  %v3705_v46 = vpop.f32.mrb[43].mxu0  ;;  %v1372_v49 = vadd.f32 %v1371_v16, %v1369_v61  ;;  %v3252_v7 = vmul.f32 -1.442695, %v2606_v33 }
 0x632   :  { %v3263_v3 = vsel %vm2917_vm12, 1.0, %v3998_v4 }
 0x633   :  { %3929 = vpow2.f32 %v3239_v38  ;;  %1374 = vrot.lane.b32.xlu1 %v1372_v49, %s4003_s0 }
 0x635   :  { %v3926_v2 = vpop.eup %3925 }
 0x636   :  { %v2361_v51 = vadd.f32 1.0, %v3926_v2 }
 0x638   :  { %3931 = vrcp.f32 %v2361_v51  ;;  %v3969_v51 = vld [vmem:[%s4698_s2 + $0x10] sm:$0x3f] }
 0x639   :  { %v3928_v52 = vpop.eup %3927 }
 0x63a   :  { %v2362_v54 = vadd.f32 1.0, %v3928_v52  ;;  %v3079_v52 = vmul.f32 %v3969_v51, %v3969_v51 }
 0x63c   :  { %3933 = vrcp.f32 %v2362_v54  ;;  %v3971_v54 = vld [vmem:[%s4698_s2 + $0x8] sm:$0xff] }
 0x63d   :  { %v3930_v55 = vpop.eup %3929 }
 0x63e   :  { %v2363_v56 = vadd.f32 1.0, %v3930_v55  ;;  %v3078_v55 = vmul.f32 %v3971_v54, %v3971_v54 }
 0x640   :  { %3935 = vrcp.f32 %v2363_v56  ;;  %v3082_v56 = vmul.f32 0.0, %v3079_v52 }
 0x641   :  { %3937 = vpow2.f32 %v3250_v5 }
 0x642   :  { %v3932_v57 = vpop.eup %3931  ;;  %3939 = vpow2.f32 %v3251_v6 }
 0x643   :  { %v2631_v58 = vmul.f32 %v3932_v57, %v4512_v36  ;;  %3941 = vpow2.f32 %v3252_v7  ;;  %v3108_v7 = vsel %vm3086_vm3, %v3079_v52, 0.0 }
 0x645   :  { %3724 = vmatmul.mubr.msk.f32.vlgmr.msra.gmra.mrb[28].mxu1 %vm681_vm11, %v2631_v58 }
 0x646   :  { %v3934_v59 = vpop.eup %3933  ;;  %3726 = vmatprep.mubr.msk.f32.mxu1 %vm3997_vm0, %v3998_v4  ;;  %3733 = vmatpush3.msk.msra.mxu1 %vm607_vm5, %v4446_v37  ;;  %v4641_v37 = vpop.xlane.xlu1 %3016  ;;  %vm1377_vm5 = vcmask 3072  }
 0x647   :  { %v2632_v60 = vmul.f32 %v3934_v59, %v4526_v34 }
 0x649   :  { %3727 = vmatmul.mubr.msk.f32.gmra.mrb[30].mxu1 %vm681_vm11, %v2632_v60  ;;  %v3087_v60 = vsel %vm3086_vm3, %v3082_v56, 0.0 }
 0x64a   :  { %v3936_v62 = vpop.eup %3935  ;;  %3729 = vmatprep.mubr.msk.f32.mxu1 %vm3997_vm0, %v3998_v4  ;;  %v4643_v36 = vpop.permute.xlu1 %1395 }
 0x64b   :  { %v2633_v1 = vmul.f32 %v3936_v62, %v4539_v44  ;;  %v3938_v8 = vpop.eup %3937  ;;  %vm1397_vm4 = vcmp.ne.s32.totalorder %v4643_v36, 0 }
 0x64c   :  { %v2622_v10 = vadd.f32 1.0, %v3938_v8  ;;  %v3940_v14 = vpop.eup %3939  ;;  %vm1398_vm7 = vmor %vm1393_vm2, %vm1397_vm4 }
 0x64d   :  { %3730 = vmatmul.mubr.msk.f32.gmra.mrb[32].mxu1 %vm681_vm11, %v2633_v1  ;;  %v3942_v17 = vpop.eup %3941 }
 0x64e   :  { %3734 = vmatprep.mubr.msk.f32.mxu1 %vm3997_vm0, %v3998_v4  ;;  %3943 = vrcp.f32 %v2622_v10  ;;  %v2624_v18 = vadd.f32 1.0, %v3942_v17 }
 0x651   :  { %3735 = vmatmul.mubr.msk.f32.vlgmr.msra.gmra.mrb[28].mxu1 %vm603_vm6, %v4552_v50 }
 0x652   :  { %3737 = vmatprep.mubr.msk.f32.mxu1 %vm3997_vm0, %v3998_v4 }
 0x655   :  { %3738 = vmatmul.mubr.msk.f32.gmra.mrb[30].mxu1 %vm603_vm6, %v4552_v50 }
 0x656   :  { %3740 = vmatprep.mubr.msk.f32.mxu1 %vm3997_vm0, %v3998_v4  ;;  %vm3272_vm0 = vcmp.ne.s32.totalorder %v4612_v13, 1 }
 0x658   :  { %v3944_v25 = vpop.eup %3943 }
 0x659   :  { %3741 = vmatmul.mubr.msk.f32.gmra.mrb[32].mxu1 %vm603_vm6, %v4552_v50  ;;  %v2623_v50 = vadd.f32 1.0, %v3940_v14  ;;  %vm3273_vm6 = vcmp.ne.s32.totalorder %v4614_v41, 1  ;;  %v2997_v14 = vld [vmem:[%s4706_s10] sm:$0xf] }
 0x65a   :  { %vm3829_vm10 = vmpackc.low %vm3273_vm6, %vm3272_vm0 }
 0x6a5   :  { %v1375_v34 = vpop.permute.xlu1 %1374 }
 0x6a6   :  { %v1378_v44 = vsel %vm1377_vm5, %v1375_v34, 0.0 }
 0x6a7   :  { %1379 = vadd.xlane.f32.xlu1 %v1378_v44 }
 0x724   :  { %v2869_v15 = vpop.f32.mrb[28].mxu1 }
 0x725   :  { %3945 = vtanh.f32 %v2869_v15  ;;  %v3736_v40 = vpop.f32.mrb[29].mxu1  ;;  %v2999_v15 = vadd.f32 1e-08, %v2997_v14 }
 0x726   :  { %3947 = vrcp.f32 %v2623_v50  ;;  %v3021_v50 = vpop.xlane.xlu0 %3020 }
 0x728   :  { %v2874_v19 = vpop.f32.mrb[30].mxu1 }
 0x729   :  { %3949 = vtanh.f32 %v2874_v19  ;;  %v3739_v21 = vpop.f32.mrb[31].mxu1 }
 0x72a   :  { %3951 = vrcp.f32 %v2624_v18 }
 0x72c   :  { %v2879_v20 = vpop.f32.mrb[32].mxu1 }
 0x72d   :  { %3953 = vtanh.f32 %v2879_v20  ;;  %v3742_v24 = vpop.f32.mrb[33].mxu1 }
 0x72e   :  { %3955 = vrcp.f32 %v2999_v15 }
 0x72f   :  { %v3946_v26 = vpop.eup %3945 }
 0x730   :  { %v2889_v27 = vmul.f32 %v3946_v26, %v3944_v25  ;;  %v3948_v28 = vpop.eup %3947 }
 0x733   :  { %v3950_v29 = vpop.eup %3949 }
 0x734   :  { %v2890_v30 = vmul.f32 %v3950_v29, %v3948_v28  ;;  %v1380_v31 = vpop.xlane.xlu1 %1379  ;;  %v3952_v32 = vpop.eup %3951 }
 0x735   :  { %v1381_v35 = vrot.slane %v1380_v31, 4 }
 0x736   :  { %v3828_v43 = vpack.c.bf16 %v2890_v30, %v2889_v27 }
 0x737   :  { %v3954_v0 = vpop.eup %3953  ;;  %v1382_v47 = vadd.f32 %v1381_v35, %v1380_v31 }
 0x738   :  { %3830 = vmatpush3.bf16.msk.msra.mxu0 %vm3829_vm10, %v3828_v43  ;;  %v2891_v48 = vmul.f32 %v3954_v0, %v3952_v32  ;;  %v3956_v19 = vpop.eup %3955 }
 0x739   :  { %3747 = vmatprep.subr.mxu0 %v3998_v4  ;;  %v1383_v13 = vrot.slane %v1382_v47, 2 }
 0x73a   :  { %v2912_v41 = vsel %vm2909_vm14, 0.0, %v2891_v48 }
 0x73b   :  { %v1384_v42 = vadd.f32 %v1383_v13, %v1382_v47 }
 0x73c   :  { %3748 = vmatpush3.msk.msra.mxu0 %vm1999_vm13, %v2912_v41  ;;  %vm3069_vm13 = vcmp.lt.s32.totalorder %v4413_v11, 9 }
 0x73d   :  { %3750 = vmatmul.mubr.msk.f32.vlgmr.msra.gmra.mrb[44].mxu0 %vm2920_vm15, %v3263_v3  ;;  %v1385_v33 = vrot.slane %v1384_v42, 1 }
 0x73f   :  { %v1386_v61 = vadd.f32 %v1385_v33, %v1384_v42 }
 0x741   :  { %3879 = vpush %v1386_v61 }
 0x772   :  { %s3880_s10 = spop %3879 }
 0x810   :  { %v2993_v16 = vpop.f32.mrb[44].mxu0 }
 0x811   :  { %v3006_v38 = vmul.f32 %v2993_v16, %v4430_v23  ;;  %v3010_v39 = vmul.f32 %v2993_v16, %v4594_v53  ;;  %v3751_v46 = vpop.f32.mrb[45].mxu0  ;;  %v3970_v23 = vld [vmem:[%s4698_s2] sm:$0xff] }
 0x812   :  { %v3077_v53 = vmul.f32 %v3970_v23, %v3970_v23 }
 0x813   :  { %v3007_v49 = vsel %vm1352_vm1, %v3006_v38, 0.0  ;;  %v3011_v2 = vsel %vm1352_vm1, %v3010_v39, 0.0 }
 0x814   :  { %3008 = vadd.xlane.f32.xlu0 %v3007_v49  ;;  %v3083_v58 = vsel %vm681_vm11, %v3077_v53, 0.0  ;;  %v3102_v44 = vmul.f32 0.0, %v3077_v53 }
 0x816   :  { %v3105_v6 = vsel %vm681_vm11, %v3102_v44, 0.0 }
 0x818   :  { %3012 = vadd.xlane.f32.xlu0 %v3011_v2 }
 0x82e   :  { %1399 = vrot.lane.b32.xlu0 %v4609_v12, %s4004_s29  ;;  %v3271_v12 = vsel %vm3069_vm13, 1.0, %v3998_v4 }
 0x82f   :  { %v3081_v57 = vmul.f32 %v3271_v12, %v3078_v55  ;;  %v3100_v34 = vsub.f32 1.0, %v3271_v12 }
 0x831   :  { %v3084_v59 = vsel %vm681_vm11, %v3081_v57, 0.0  ;;  %v3103_v5 = vmul.f32 %v3100_v34, %v3078_v55 }
 0x832   :  { %v3085_v62 = vadd.f32 %v3084_v59, %v3083_v58 }
 0x833   :  { %v3106_v11 = vsel %vm681_vm11, %v3103_v5, 0.0 }
 0x834   :  { %v3088_v1 = vadd.f32 %v3087_v60, %v3085_v62  ;;  %v3107_v8 = vadd.f32 %v3106_v11, %v3105_v6 }
 0x836   :  { %3089 = vadd.xlane.f32.xlu1 %v3088_v1  ;;  %v3109_v10 = vadd.f32 %v3108_v7, %v3107_v8  ;;  %v1388_v8 = vstv %s3880_s10 }
 0x837   :  { %v1389_v15 = vsub.f32 0.0, %v1388_v8 }
 0x8a1   :  { %v3009_v17 = vpop.xlane.xlu0 %3008 }
 0x8a5   :  { %v3013_v40 = vpop.xlane.xlu0 %3012 }
 0x8a9   :  { %v1400_v18 = vpop.permute.xlu0 %1399 }
 0x8aa   :  { %vm1401_vm1 = vcmp.ne.s32.totalorder %v1400_v18, 0 }
 0x8ab   :  { %vm1402_vm11 = vmor %vm1398_vm7, %vm1401_vm1 }
 0x8ac   :  { %v3196_v21 = vsel %vm1402_vm11, 1.0, %v3998_v4 }
 0x8ad   :  { %vm2998_vm0 = vcmp.gt.f32.partialorder %v3196_v21, 0.0  ;;  %v3040_v20 = vsel %vm1377_vm5, %v3196_v21, 0.0 }
 0x8ae   :  { %v3002_v22 = vsel %vm2998_vm0, %v3956_v19, 0.0  ;;  %3041 = vadd.xlane.f32.xlu0 %v3040_v20 }
 0x8af   :  { %v3022_v24 = vsub.f32 1.0, %v3002_v22  ;;  %v3024_v26 = vmul.f32 %v4641_v37, %v3002_v22  ;;  %v3027_v27 = vmul.f32 %v3021_v50, %v3002_v22  ;;  %v1390_v22 = vmul.f32 0.25, %v1389_v15 }
 0x8b1   :  { %v3023_v25 = vmul.f32 %v3022_v24, %v3009_v17  ;;  %v3026_v36 = vmul.f32 %v3022_v24, %v3013_v40 }
 0x8b3   :  { %v3025_v63 = vadd.f32 %v3024_v26, %v3023_v25  ;;  %v3028_v45 = vadd.f32 %v3027_v27, %v3026_v36 }
 0x8b5   :  { %v3029_v28 = vsub.f32 %v3025_v63, %v3028_v45  ;;  %v3136_v63 = vmul.f32 0.5, %v1390_v22 }
 0x8b7   :  { %v3270_v29 = vmul.f32 -1.442695, %v3029_v28 }
 0x8b9   :  { %3957 = vpow2.f32 %v3270_v29 }
 0x8c3   :  { %v3958_v30 = vpop.eup %3957  ;;  %v3090_v61 = vpop.xlane.xlu1 %3089 }
 0x8c4   :  { %v3033_v31 = vadd.f32 1.0, %v3958_v30  ;;  %v3091_v16 = vrot.slane %v3090_v61, 4 }
 0x8c6   :  { %3959 = vrcp.f32 %v3033_v31  ;;  %v3092_v38 = vadd.f32 %v3091_v16, %v3090_v61 }
 0x8c8   :  { %v3093_v39 = vrot.slane %v3092_v38, 2 }
 0x8ca   :  { %v3094_v51 = vadd.f32 %v3093_v39, %v3092_v38 }
 0x8cc   :  { %v3095_v56 = vrot.slane %v3094_v51, 1 }
 0x8ce   :  { %v3096_v60 = vadd.f32 %v3095_v56, %v3094_v51 }
 0x8d0   :  { %v3960_v4 = vpop.eup %3959 }
 0x8d1   :  { %v3036_v32 = vadd.f32 1e-10, %v3960_v4 }
 0x8d3   :  { %3961 = vlog2.f32 %v3036_v32 }
 0x8dd   :  { %v3962_v9 = vpop.eup %3961 }
 0x8de   :  { %v3038_v35 = vmul.f32 0.6931472, %v3962_v9 }
 0x8e0   :  { %v3039_v43 = vsub.f32 0.0, %v3038_v35 }
 0x8e2   :  { %v3051_v0 = vmul.f32 %v3196_v21, %v3039_v43 }
 0x8e4   :  { %v3052_v47 = vsel %vm1377_vm5, %v3051_v0, 0.0 }
 0x8e5   :  { %3053 = vadd.xlane.f32.xlu0 %v3052_v47 }
 0x8e9   :  { %3110 = vadd.xlane.f32.xlu0 %v3109_v10 }
 0x93b   :  { %v3042_v37 = vpop.xlane.xlu0 %3041 }
 0x93c   :  { %v3043_v48 = vrot.slane %v3042_v37, 4 }
 0x93e   :  { %v3044_v13 = vadd.f32 %v3043_v48, %v3042_v37 }
 0x940   :  { %v3045_v41 = vrot.slane %v3044_v13, 2 }
 0x942   :  { %v3046_v3 = vadd.f32 %v3045_v41, %v3044_v13 }
 0x944   :  { %v3047_v42 = vrot.slane %v3046_v3, 1 }
 0x946   :  { %v3048_v33 = vadd.f32 %v3047_v42, %v3046_v3 }
 0x948   :  { %3881 = vpush %v3048_v33 }
 0x972   :  { %v3054_v46 = vpop.xlane.xlu0 %3053 }
 0x973   :  { %v3055_v49 = vrot.slane %v3054_v46, 4 }
 0x975   :  { %v3056_v2 = vadd.f32 %v3055_v49, %v3054_v46 }
 0x976   :  { %v3111_v52 = vpop.xlane.xlu0 %3110 }
 0x977   :  { %v3057_v23 = vrot.slane %v3056_v2, 2  ;;  %v3112_v53 = vrot.slane %v3111_v52, 4 }
 0x979   :  { %v3113_v54 = vadd.f32 %v3112_v53, %v3111_v52  ;;  %v3058_v55 = vadd.f32 %v3057_v23, %v3056_v2  ;;  %s3882_s16 = spop %3881 }
 0x97a   :  { %v3050_v34 = vstv %s3882_s16 }
 0x97b   :  { %v3114_v12 = vrot.slane %v3113_v54, 2  ;;  %v3059_v57 = vrot.slane %v3058_v55, 1  ;;  %v3064_v44 = vmax.f32 %v3050_v34, 1.0  ;;  %vm3063_vm5 = vcmp.gt.f32.partialorder %v3050_v34, 0.0 }
 0x97d   :  { %v3115_v58 = vadd.f32 %v3114_v12, %v3113_v54  ;;  %v3060_v59 = vadd.f32 %v3059_v57, %v3058_v55  ;;  %3963 = vrcp.f32 %v3064_v44 }
 0x97f   :  { %3883 = vpush %v3060_v59  ;;  %v3116_v62 = vrot.slane %v3115_v58, 1 }
 0x980   :  { %3885 = vpush %v3096_v60 }
 0x981   :  { %v3117_v1 = vadd.f32 %v3116_v62, %v3115_v58 }
 0x983   :  { %3887 = vpush %v3117_v1 }
 0x987   :  { %v3964_v7 = vpop.eup %3963 }
 0x9b0   :  { %s3884_s17 = spop %3883 }
 0x9b1   :  { %s3886_s1 = spop %3885  ;;  %v3062_v11 = vstv %s3884_s17 }
 0x9b2   :  { %v3098_v5 = vstv %s3886_s1  ;;  %v3066_v14 = vmul.f32 %v3964_v7, %v3062_v11 }
 0x9b3   :  { %3965 = vrsqrt.f32 %v3098_v5  ;;  %vm3122_vm2 = vcmp.eq.f32.partialorder %v3098_v5, inf  ;;  %v3125_v21 = vand.u32 2147483648, %v3098_v5  ;;  %vm3124_vm8 = vcmp.eq.f32.partialorder %v3098_v5, 0.0 }
 0x9b4   :  { %s3888_s18 = spop %3887  ;;  %v3067_v19 = vsel %vm3063_vm5, %v3066_v14, 0.0 }
 0x9b5   :  { %v3119_v6 = vstv %s3888_s18  ;;  %v3137_v36 = vmul.f32 0.5, %v3067_v19 }
 0x9b6   :  { %3967 = vrsqrt.f32 %v3119_v6  ;;  %vm3129_vm6 = vcmp.eq.f32.partialorder %v3119_v6, inf  ;;  %v3132_v20 = vand.u32 2147483648, %v3119_v6  ;;  %vm3131_vm9 = vcmp.eq.f32.partialorder %v3119_v6, 0.0 }
 0x9b7   :  { %v3138_v28 = vadd.f32 %v3137_v36, %v3136_v63 }
 0x9bd   :  { %v3966_v10 = vpop.eup %3965 }
 0x9be   :  { %v3121_v50 = vmul.f32 %v3966_v10, %v3098_v5 }
 0x9c0   :  { %v3968_v17 = vpop.eup %3967  ;;  %v3123_v18 = vsel %vm3122_vm2, %v3098_v5, %v3121_v50 }
 0x9c1   :  { %v3128_v40 = vmul.f32 %v3968_v17, %v3119_v6  ;;  %v3126_v25 = vsel %vm3124_vm8, %v3125_v21, %v3123_v18 }
 0x9c3   :  { %v3130_v24 = vsel %vm3129_vm6, %v3119_v6, %v3128_v40 }
 0x9c4   :  { %v3133_v26 = vsel %vm3131_vm9, %v3132_v20, %v3130_v24 }
 0x9c5   :  { %v3134_v27 = vadd.f32 %v3133_v26, %v3126_v25 }
 0x9c7   :  { %v3135_v45 = vmul.f32 0.07692308, %v3134_v27 }
 0x9c9   :  { %v3139_v29 = vmul.f32 0.01, %v3135_v45 }
 0x9cb   :  { %v3140_v30 = vadd.f32 %v3139_v29, %v3138_v28 }
 0x9cd   :  { %3141 = vst [vmem:[#allocation2] sm:$0x1] %v3140_v30 }
 0x9ce   :  { %3983 = shalt.err (!%p3980_p4)
}
 0x9cf   :  { %s3984_s22 = scalar_lea.hbm %s4707_s11, 16 }
 0x9d0   :  { %p3985_p5 = scmp.ne.s32.totalorder %s4707_s11, %s3984_s22  ;;  %p3988_p6 = scmp.lt.u32.totalorder %s3984_s22, %s4707_s11 }
 0x9d2   :  { %p3990_p7 = pnand %p3988_p6, %p3985_p5 }
 0x9d4   :  { %3993 = shalt.err (!%p3990_p7)
}
 0x9d5   :  { %3151 = dma.vmem_to_hbm [thread:$0]  %s3149_s19, 16, %s4707_s11, [#allocation3]  }
 0x9d6   :  { %3994 = dma.done.wait [#allocation3], 16  }
 0x9d7   :  { %3995 = vsyncadd [#allocation3], 4294967280 }
 0x9d8   :  { %3155 = vsyncpa [#allocation3], 1 }

</bundles_post_ra>
